<compile_context>
chip_gen: v7x
topology: tpu7x:2x2x1
jax: 0.10.0
libtpu: 0.0.40
codegen_flags: <defaults>
</compile_context>

<pallas_src>
import numpy as np
import jax
import jax.numpy as jnp
from jax.experimental import pallas as pl
from jax.experimental.pallas import tpu as pltpu


# ----------------------------------------------------------------------------
# Tree parsing (pure Python glue, mirrors the PyTorch reference)
# ----------------------------------------------------------------------------
node_dict = {0: '0', 1: '1', 2: '2', 3: 'a', 4: 'b', 5: 'c', 6: 'd', 7: 'e',
             8: 'f', 9: 'g', 10: 'h', 11: 'A', 12: 'B', 13: 'C', 14: 'D',
             15: 'E', 16: 'F', 17: 'G', 18: 'H', 19: None}
char_to_node_type = {v: k for k, v in node_dict.items() if v is not None}
composite_chars = {'0', '1', '2'}


class TreeNode:
    def __init__(self, name, node_type, children=None):
        self.name = name
        self.node_type = node_type
        self.children = children if children else []


def string_to_tree_node(tree_string, node_id=0):
    assert tree_string[0] == '(' and tree_string[-1] == ')'
    node_type_char = tree_string[1]
    if node_type_char in composite_chars:
        node_type = char_to_node_type[node_type_char]
        name = f'composite_{node_id}'
        node_id += 1
    elif node_type_char in char_to_node_type:
        return TreeNode(f'leaf_{node_type_char}', char_to_node_type[node_type_char])
    else:
        raise ValueError(f'unknown node type char: {node_type_char}')
    children = []
    i = 2
    while i < len(tree_string) - 1:
        c = tree_string[i]
        if c == '(':
            depth = 1
            start = i
            while depth != 0:
                i += 1
                if tree_string[i] == '(':
                    depth += 1
                elif tree_string[i] == ')':
                    depth -= 1
            children.append(string_to_tree_node(tree_string[start:i + 1], node_id))
            i += 1
        elif c in char_to_node_type:
            children.append(TreeNode(f'leaf_{c}', char_to_node_type[c]))
            i += 1
        else:
            i += 1
    return TreeNode(name, node_type, children)


# ----------------------------------------------------------------------------
# Model sizes (small, consistent with the module's __init__)
# ----------------------------------------------------------------------------
VOCAB = 20        # node_type_vocab_size
EMBED = 16        # embed_size
HIDDEN = 32       # hidden_size
A1 = 20           # action1_size (node type to expand)
A2 = 8            # action2_size (location)

MAX_NODES = 32            # max tree nodes per tree (schedule padded to this)
MAX_CHILDREN = 8          # max fan-out per node
CIDX_LEN = MAX_NODES + MAX_CHILDREN   # per-tree child-index slab (pad slack
                                      # guarantees cs + t stays in-segment)
OUT_W = 128               # lane-dense packed output width


# ----------------------------------------------------------------------------
# Fused Pallas kernel: one grid step = one whole tree
# ----------------------------------------------------------------------------
def _rvnn_kernel(
    # ---- SMEM scalar-prefetch schedule (flattened 1-D, post-order per tree)
    node_type_ref,     # (B*MAX_NODES,) i32
    child_start_ref,   # (B*MAX_NODES,) i32  offset into the tree's cidx slab
    child_count_ref,   # (B*MAX_NODES,) i32
    child_idx_ref,     # (B*CIDX_LEN,)  i32  flat child slot indices
    nnodes_ref,        # (B,)           i32
    # ---- VMEM weights (resident for the whole call)
    embp_ref,          # (VOCAB, 1, H)  precomputed  emb @ W_c[:E] + b_c
    wch_ref,           # (H, H)         W_c block acting on the child encoding
    wih3_ref,          # (H, 3H)        GRU input weights   [r | z | n]
    bgi_ref,           # (1, 3H)        b_ih + [b_hr | b_hz | 0]   (folded)
    whh3_ref,          # (H, 3H)        GRU hidden weights  [r | z | n]
    bhn_ref,           # (1, H)         b_hn (scaled by r -> stays in the step)
    w12_ref,           # (H, A1+A2)     fused action heads
    b12_ref,           # (1, A1+A2)
    # ---- output (leading batch dim squeezed by the BlockSpec)
    out_ref,           # (8, OUT_W)   row0=h, row1=p1, row2=p2 (lane offset 0)
    # ---- scratch
    h_states,          # VMEM (MAX_NODES, 1, H)        per-node hidden states
    gi_buf,            # VMEM (MAX_CHILDREN, 1, 3H)    hoisted input projections
):
    H = HIDDEN
    f32 = jnp.float32
    b = pl.program_id(0)
    nbase = b * MAX_NODES
    cbase = b * CIDX_LEN
    n = nnodes_ref[b]

    def node_body(i, carry):
        nt = node_type_ref[nbase + i]
        cc = child_count_ref[nbase + i]
        cs = child_start_ref[nbase + i]

        # ---- hoisted GRU input projection (skipped entirely for leaves) ----
        @pl.when(cc > 0)
        def _():
            wih3 = wih3_ref[...]            # read once per node, not per child
            bgi = bgi_ref[...]
            for t in range(MAX_CHILDREN):   # static unroll: matmuls pipeline
                cidx = jnp.where(t < cc, child_idx_ref[cbase + cs + t], 0)
                ch = h_states[cidx]                                   # (1, H)
                gi_buf[t] = jnp.dot(ch, wih3,
                                    preferred_element_type=f32) + bgi  # (1,3H)

        # ---- serial GRU recurrence: ONE matmul per step ---------------------
        def gru_step(t, h):
            gt = gi_buf[t]                                            # (1, 3H)
            hg = jnp.dot(h, whh3_ref[...], preferred_element_type=f32)
            r = jax.nn.sigmoid(gt[:, 0:H] + hg[:, 0:H])
            z = jax.nn.sigmoid(gt[:, H:2 * H] + hg[:, H:2 * H])
            nn_ = jnp.tanh(gt[:, 2 * H:3 * H]
                           + r * (hg[:, 2 * H:3 * H] + bhn_ref[...]))
            return (1.0 - z) * nn_ + z * h

        # Leaves (cc == 0) run zero iterations -> child_enc stays zero, which
        # reproduces the zero-padding path of the reference module.
        child_enc = jax.lax.fori_loop(0, cc, gru_step, jnp.zeros((1, H), f32))

        # ---- h = tanh(embp[nt] + child_enc @ W_c[E:]) -----------------------
        h_states[i] = jnp.tanh(
            embp_ref[nt]
            + jnp.dot(child_enc, wch_ref[...], preferred_element_type=f32))
        return carry

    jax.lax.fori_loop(0, n, node_body, 0)

    # ---- fused action heads on the root encoding (last node in post-order) --
    h_root = h_states[n - 1]                                          # (1, H)
    logits = jnp.dot(h_root, w12_ref[...],
                     preferred_element_type=f32) + b12_ref[...]       # (1, A1+A2)

    def softmax(l):
        m = jnp.max(l, axis=-1, keepdims=True)
        e = jnp.exp(l - m)
        return e / jnp.sum(e, axis=-1, keepdims=True)

    p1 = softmax(logits[:, 0:A1])                                     # (1, A1)
    p2 = softmax(logits[:, A1:A1 + A2])                               # (1, A2)

    # Single lane-dense output slab (one output block per tree).
    out_ref[...] = jnp.zeros((8, OUT_W), f32)
    out_ref[0:1, 0:HIDDEN] = h_root
    out_ref[1:2, 0:A1] = p1
    out_ref[2:3, 0:A2] = p2


@jax.jit
def _rvnn_forward(node_type, child_start, child_count, child_idx, nnodes, kp):
    B = nnodes.shape[0]
    grid_spec = pltpu.PrefetchScalarGridSpec(
        num_scalar_prefetch=5,
        grid=(B,),
        in_specs=[
            pl.BlockSpec((VOCAB, 1, HIDDEN), lambda b, *_: (0, 0, 0)),
            pl.BlockSpec((HIDDEN, HIDDEN), lambda b, *_: (0, 0)),
            pl.BlockSpec((HIDDEN, 3 * HIDDEN), lambda b, *_: (0, 0)),
            pl.BlockSpec((1, 3 * HIDDEN), lambda b, *_: (0, 0)),
            pl.BlockSpec((HIDDEN, 3 * HIDDEN), lambda b, *_: (0, 0)),
            pl.BlockSpec((1, HIDDEN), lambda b, *_: (0, 0)),
            pl.BlockSpec((HIDDEN, A1 + A2), lambda b, *_: (0, 0)),
            pl.BlockSpec((1, A1 + A2), lambda b, *_: (0, 0)),
        ],
        out_specs=pl.BlockSpec((None, 8, OUT_W), lambda b, *_: (b, 0, 0)),
        scratch_shapes=[
            pltpu.VMEM((MAX_NODES, 1, HIDDEN), jnp.float32),
            pltpu.VMEM((MAX_CHILDREN, 1, 3 * HIDDEN), jnp.float32),
        ],
    )
    out = pl.pallas_call(
        _rvnn_kernel,
        out_shape=jax.ShapeDtypeStruct((B, 8, OUT_W), jnp.float32),
        grid_spec=grid_spec,
        compiler_params=pltpu.CompilerParams(
            dimension_semantics=("parallel",)),   # trees independent -> 2nd TC on v7x
    )(node_type, child_start, child_count, child_idx, nnodes,
      kp['embp'], kp['wch'], kp['wih3'], kp['bgi'],
      kp['whh3'], kp['bhn'], kp['w12'], kp['b12'])
    return out[:, 0, :HIDDEN], out[:, 1, :A1], out[:, 2, :A2]


# ----------------------------------------------------------------------------
# Host-side schedule construction (data-dependent tree -> flat padded arrays)
# ----------------------------------------------------------------------------
def build_schedule(root):
    node_types, child_lists = [], []

    def visit(node):
        idxs = [visit(c) for c in node.children]   # children first (post-order)
        my = len(node_types)
        node_types.append(node.node_type)
        child_lists.append(idxs)
        return my

    visit(root)
    n = len(node_types)
    if n > MAX_NODES:
        raise ValueError(f"tree has {n} nodes > MAX_NODES={MAX_NODES}")

    nt = np.zeros(MAX_NODES, np.int32)
    cstart = np.zeros(MAX_NODES, np.int32)
    ccount = np.zeros(MAX_NODES, np.int32)
    cidx = np.zeros(CIDX_LEN, np.int32)
    off = 0
    for i, (t, ch) in enumerate(zip(node_types, child_lists)):
        if len(ch) > MAX_CHILDREN:
            raise ValueError(f"node {i} has {len(ch)} children > {MAX_CHILDREN}")
        nt[i] = t
        cstart[i] = off
        ccount[i] = len(ch)
        cidx[off:off + len(ch)] = ch
        off += len(ch)
    return nt, cstart, ccount, cidx, n


def build_batched_schedule(roots):
    scheds = [build_schedule(r) for r in roots]
    nt = np.concatenate([s[0] for s in scheds])
    cs = np.concatenate([s[1] for s in scheds])
    cc = np.concatenate([s[2] for s in scheds])
    ci = np.concatenate([s[3] for s in scheds])
    nn = np.array([s[4] for s in scheds], np.int32)
    return nt, cs, cc, ci, nn


def predict_from_bt_strings(bt_strings, kparams):
    roots = [string_to_tree_node(s) for s in bt_strings]
    sched = build_batched_schedule(roots)
    return _rvnn_forward(*[jnp.asarray(a) for a in sched], kparams)


def predict_from_bt_string(bt_string, kparams):
    h, p1, p2 = predict_from_bt_strings([bt_string], kparams)
    return h[0], p1[0], p2[0]


# ----------------------------------------------------------------------------
# Parameters: logical (PyTorch-like) layout + packing into kernel layout
# ----------------------------------------------------------------------------
def init_params(key):
    ks = jax.random.split(key, 12)
    s = 0.1
    H = HIDDEN
    return {
        'emb': s * jax.random.normal(ks[0], (VOCAB, EMBED), jnp.float32),
        'wce': s * jax.random.normal(ks[1], (EMBED, H), jnp.float32),
        'wch': s * jax.random.normal(ks[2], (H, H), jnp.float32),
        'bc':  s * jax.random.normal(ks[3], (1, H), jnp.float32),
        # GRU per-gate (H, H) matrices, gate order r, z, n (x @ W layout).
        'wih': s * jax.random.normal(ks[4], (3, H, H), jnp.float32),
        'whh': s * jax.random.normal(ks[5], (3, H, H), jnp.float32),
        'bih': s * jax.random.normal(ks[6], (3, 1, H), jnp.float32),
        'bhh': s * jax.random.normal(ks[7], (3, 1, H), jnp.float32),
        'w1':  s * jax.random.normal(ks[8], (H, A1), jnp.float32),
        'b1':  s * jax.random.normal(ks[9], (1, A1), jnp.float32),
        'w2':  s * jax.random.normal(ks[10], (H, A2), jnp.float32),
        'b2':  s * jax.random.normal(ks[11], (1, A2), jnp.float32),
    }


def pack_params(p):
    """Fold / fuse logical params into the kernel layout (one-time cost)."""
    embp = (p['emb'] @ p['wce'] + p['bc']).reshape(VOCAB, 1, HIDDEN)
    wih3 = jnp.concatenate([p['wih'][0], p['wih'][1], p['wih'][2]], axis=1)
    whh3 = jnp.concatenate([p['whh'][0], p['whh'][1], p['whh'][2]], axis=1)
    bgi = jnp.concatenate([p['bih'][0] + p['bhh'][0],      # b_ir + b_hr
                           p['bih'][1] + p['bhh'][1],      # b_iz + b_hz
                           p['bih'][2]], axis=1)           # b_in (b_hn kept apart)
    return {
        'embp': embp,
        'wch': p['wch'],
        'wih3': wih3,
        'bgi': bgi,
        'whh3': whh3,
        'bhn': p['bhh'][2],
        'w12': jnp.concatenate([p['w1'], p['w2']], axis=1),
        'b12': jnp.concatenate([p['b1'], p['b2']], axis=1),
    }


# ----------------------------------------------------------------------------
# Pure-JAX reference (host recursion) for numerical verification
# ----------------------------------------------------------------------------
def _ref_encode(node, p):
    emb = p['emb'][node.node_type]                                   # (EMBED,)
    child_enc = jnp.zeros((HIDDEN,), jnp.float32)
    if node.children:
        h = jnp.zeros((HIDDEN,), jnp.float32)
        for c in node.children:
            x = _ref_encode(c, p)
            r = jax.nn.sigmoid(x @ p['wih'][0] + p['bih'][0, 0]
                               + h @ p['whh'][0] + p['bhh'][0, 0])
            z = jax.nn.sigmoid(x @ p['wih'][1] + p['bih'][1, 0]
                               + h @ p['whh'][1] + p['bhh'][1, 0])
            nn_ = jnp.tanh(x @ p['wih'][2] + p['bih'][2, 0]
                           + r * (h @ p['whh'][2] + p['bhh'][2, 0]))
            h = (1.0 - z) * nn_ + z * h
        child_enc = h
    return jnp.tanh(emb @ p['wce'] + child_enc @ p['wch'] + p['bc'][0])


def _ref_predict(bt_string, p):
    root = string_to_tree_node(bt_string)
    h = _ref_encode(root, p)
    p1 = jax.nn.softmax(h @ p['w1'] + p['b1'][0])
    p2 = jax.nn.softmax(h @ p['w2'] + p['b2'][0])
    return h, p1, p2


# ----------------------------------------------------------------------------
if __name__ == "__main__":
    key = jax.random.PRNGKey(0)
    lparams = init_params(key)
    kparams = pack_params(lparams)

    # Two trees batched into ONE pallas_call (grid over trees).
    bt_strings = ["(0a(1bC)(2dE)f)", "(1(0ab)(2cd(1ef))gh)"]
    h, p1, p2 = predict_from_bt_strings(bt_strings, kparams)
    jax.block_until_ready((h, p1, p2))

    B = len(bt_strings)
    assert h.shape == (B, HIDDEN)
    assert p1.shape == (B, A1) and p2.shape == (B, A2)
    assert bool(jnp.isfinite(h).all())
    assert bool(jnp.all(jnp.abs(jnp.sum(p1, axis=-1) - 1.0) < 1e-4))
    assert bool(jnp.all(jnp.abs(jnp.sum(p2, axis=-1) - 1.0) < 1e-4))

    # Numerical check against the pure-JAX reference (loose tolerance to allow
    # for MXU default f32 matmul precision and the algebraic refactoring).
    for bi, s in enumerate(bt_strings):
        h_r, p1_r, p2_r = _ref_predict(s, lparams)
        assert bool(jnp.allclose(h[bi], h_r, atol=5e-3, rtol=0)), "h mismatch"
        assert bool(jnp.allclose(p1[bi], p1_r, atol=5e-3, rtol=0)), "p1 mismatch"
        assert bool(jnp.allclose(p2[bi], p2_r, atol=5e-3, rtol=0)), "p2 mismatch"

    print("KERNEL_OK")
</pallas_src>

<mosaic_0001>
module attributes {stable_mosaic.version = 11 : i64} {
  func.func @_rvnn_kernel(%arg0: i32, %arg1: memref<64xi32, #tpu.memory_space<smem>>, %arg2: memref<64xi32, #tpu.memory_space<smem>>, %arg3: memref<64xi32, #tpu.memory_space<smem>>, %arg4: memref<80xi32, #tpu.memory_space<smem>>, %arg5: memref<2xi32, #tpu.memory_space<smem>>, %arg6: memref<20x1x32xf32, #tpu.memory_space<vmem>>, %arg7: memref<32x32xf32, #tpu.memory_space<vmem>>, %arg8: memref<32x96xf32, #tpu.memory_space<vmem>>, %arg9: memref<1x96xf32, #tpu.memory_space<vmem>>, %arg10: memref<32x96xf32, #tpu.memory_space<vmem>>, %arg11: memref<1x32xf32, #tpu.memory_space<vmem>>, %arg12: memref<32x28xf32, #tpu.memory_space<vmem>>, %arg13: memref<1x28xf32, #tpu.memory_space<vmem>>, %arg14: memref<1x8x128xf32, #tpu.memory_space<vmem>>, %arg15: memref<32x1x32xf32, #tpu.memory_space<vmem>>, %arg16: memref<8x1x96xf32, #tpu.memory_space<vmem>>) attributes {dimension_semantics = [#tpu.dimension_semantics<parallel>], iteration_bounds = array<i64: 2>, scalar_prefetch = 5 : i64, scratch_operands = 2 : i64, tpu.core_type = #tpu.core_type<tc>, window_params = [{pipeline_mode = #tpu.pipeline_mode<synchronous>, transform_indices = @transform_0, window_bounds = array<i64: 20, 1, 32>}, {pipeline_mode = #tpu.pipeline_mode<synchronous>, transform_indices = @transform_1, window_bounds = array<i64: 32, 32>}, {pipeline_mode = #tpu.pipeline_mode<synchronous>, transform_indices = @transform_2, window_bounds = array<i64: 32, 96>}, {pipeline_mode = #tpu.pipeline_mode<synchronous>, transform_indices = @transform_3, window_bounds = array<i64: 1, 96>}, {pipeline_mode = #tpu.pipeline_mode<synchronous>, transform_indices = @transform_4, window_bounds = array<i64: 32, 96>}, {pipeline_mode = #tpu.pipeline_mode<synchronous>, transform_indices = @transform_5, window_bounds = array<i64: 1, 32>}, {pipeline_mode = #tpu.pipeline_mode<synchronous>, transform_indices = @transform_6, window_bounds = array<i64: 32, 28>}, {pipeline_mode = #tpu.pipeline_mode<synchronous>, transform_indices = @transform_7, window_bounds = array<i64: 1, 28>}, {transform_indices = @transform_8, window_bounds = array<i64: 1, 8, 128>}]} {
    %c32_i32 = arith.constant 32 : i32
    %0 = arith.muli %arg0, %c32_i32 : i32
    %c40_i32 = arith.constant 40 : i32
    %1 = arith.muli %arg0, %c40_i32 : i32
    %2 = arith.index_cast %arg0 : i32 to index
    %3 = memref.load %arg5[%2] : memref<2xi32, #tpu.memory_space<smem>>
    %c0_i32 = arith.constant 0 : i32
    %c0_i32_0 = arith.constant 0 : i32
    %4 = arith.subi %3, %c0_i32_0 : i32
    %5 = arith.addi %c0_i32_0, %4 : i32
    %c1_i32 = arith.constant 1 : i32
    scf.for %arg17 = %c0_i32_0 to %5 step %c1_i32  : i32 {
      %47 = arith.addi %0, %arg17 : i32
      %48 = arith.index_cast %47 : i32 to index
      %49 = memref.load %arg1[%48] : memref<64xi32, #tpu.memory_space<smem>>
      %50 = arith.addi %0, %arg17 : i32
      %51 = arith.index_cast %50 : i32 to index
      %52 = memref.load %arg3[%51] : memref<64xi32, #tpu.memory_space<smem>>
      %53 = arith.addi %0, %arg17 : i32
      %54 = arith.index_cast %53 : i32 to index
      %55 = memref.load %arg2[%54] : memref<64xi32, #tpu.memory_space<smem>>
      %c0_i32_22 = arith.constant 0 : i32
      %56 = arith.cmpi sgt, %52, %c0_i32_22 : i32
      %57 = arith.extui %56 : i1 to i32
      %c0_i32_23 = arith.constant 0 : i32
      %58 = arith.cmpi ne, %57, %c0_i32_23 : i32
      scf.if %58 {
        %c0_34 = arith.constant 0 : index
        %c0_35 = arith.constant 0 : index
        %74 = vector.load %arg8[%c0_34, %c0_35] : memref<32x96xf32, #tpu.memory_space<vmem>>, vector<32x96xf32>
        %c0_36 = arith.constant 0 : index
        %c0_37 = arith.constant 0 : index
        %75 = vector.load %arg9[%c0_36, %c0_37] : memref<1x96xf32, #tpu.memory_space<vmem>>, vector<1x96xf32>
        %c0_i32_38 = arith.constant 0 : i32
        %76 = arith.cmpi sgt, %52, %c0_i32_38 : i32
        %77 = arith.addi %1, %55 : i32
        %c0_i32_39 = arith.constant 0 : i32
        %78 = arith.addi %77, %c0_i32_39 : i32
        %79 = arith.index_cast %78 : i32 to index
        %80 = memref.load %arg4[%79] : memref<80xi32, #tpu.memory_space<smem>>
        %c0_i32_40 = arith.constant 0 : i32
        %81 = arith.select %76, %80, %c0_i32_40 : i32
        %82 = arith.index_cast %81 : i32 to index
        %c0_41 = arith.constant 0 : index
        %c0_42 = arith.constant 0 : index
        %83 = vector.load %arg15[%82, %c0_41, %c0_42] : memref<32x1x32xf32, #tpu.memory_space<vmem>>, vector<1x1x32xf32>
        %84 = vector.shape_cast %83 : vector<1x1x32xf32> to vector<1x32xf32>
        %cst_43 = arith.constant dense<0.000000e+00> : vector<1x96xf32>
        %85 = tpu.matmul %84, %74, %cst_43 {dimension_numbers = #tpu.dot_dimension_numbers<[1], [0], [0], [1], [0, 0, 1, 1], [], []>} : vector<1x32xf32>, vector<32x96xf32>, vector<1x96xf32> -> vector<1x96xf32>
        %86 = arith.addf %85, %75 : vector<1x96xf32>
        %c0_44 = arith.constant 0 : index
        %c0_45 = arith.constant 0 : index
        %c0_46 = arith.constant 0 : index
        %87 = vector.load %arg16[%c0_44, %c0_45, %c0_46] : memref<8x1x96xf32, #tpu.memory_space<vmem>>, vector<1x1x96xf32>
        %88 = vector.shape_cast %87 : vector<1x1x96xf32> to vector<1x96xf32>
        %89 = vector.shape_cast %86 : vector<1x96xf32> to vector<1x1x96xf32>
        tpu.vector_store %arg16[%c0_44, %c0_45, %c0_46], %89 {strides = array<i32>} : memref<8x1x96xf32, #tpu.memory_space<vmem>>, vector<1x1x96xf32>,
        %c1_i32_47 = arith.constant 1 : i32
        %90 = arith.cmpi sgt, %52, %c1_i32_47 : i32
        %91 = arith.addi %1, %55 : i32
        %c1_i32_48 = arith.constant 1 : i32
        %92 = arith.addi %91, %c1_i32_48 : i32
        %93 = arith.index_cast %92 : i32 to index
        %94 = memref.load %arg4[%93] : memref<80xi32, #tpu.memory_space<smem>>
        %c0_i32_49 = arith.constant 0 : i32
        %95 = arith.select %90, %94, %c0_i32_49 : i32
        %96 = arith.index_cast %95 : i32 to index
        %c0_50 = arith.constant 0 : index
        %c0_51 = arith.constant 0 : index
        %97 = vector.load %arg15[%96, %c0_50, %c0_51] : memref<32x1x32xf32, #tpu.memory_space<vmem>>, vector<1x1x32xf32>
        %98 = vector.shape_cast %97 : vector<1x1x32xf32> to vector<1x32xf32>
        %cst_52 = arith.constant dense<0.000000e+00> : vector<1x96xf32>
        %99 = tpu.matmul %98, %74, %cst_52 {dimension_numbers = #tpu.dot_dimension_numbers<[1], [0], [0], [1], [0, 0, 1, 1], [], []>} : vector<1x32xf32>, vector<32x96xf32>, vector<1x96xf32> -> vector<1x96xf32>
        %100 = arith.addf %99, %75 : vector<1x96xf32>
        %c1_53 = arith.constant 1 : index
        %c0_54 = arith.constant 0 : index
        %c0_55 = arith.constant 0 : index
        %101 = vector.load %arg16[%c1_53, %c0_54, %c0_55] : memref<8x1x96xf32, #tpu.memory_space<vmem>>, vector<1x1x96xf32>
        %102 = vector.shape_cast %101 : vector<1x1x96xf32> to vector<1x96xf32>
        %103 = vector.shape_cast %100 : vector<1x96xf32> to vector<1x1x96xf32>
        tpu.vector_store %arg16[%c1_53, %c0_54, %c0_55], %103 {strides = array<i32>} : memref<8x1x96xf32, #tpu.memory_space<vmem>>, vector<1x1x96xf32>,
        %c2_i32 = arith.constant 2 : i32
        %104 = arith.cmpi sgt, %52, %c2_i32 : i32
        %105 = arith.addi %1, %55 : i32
        %c2_i32_56 = arith.constant 2 : i32
        %106 = arith.addi %105, %c2_i32_56 : i32
        %107 = arith.index_cast %106 : i32 to index
        %108 = memref.load %arg4[%107] : memref<80xi32, #tpu.memory_space<smem>>
        %c0_i32_57 = arith.constant 0 : i32
        %109 = arith.select %104, %108, %c0_i32_57 : i32
        %110 = arith.index_cast %109 : i32 to index
        %c0_58 = arith.constant 0 : index
        %c0_59 = arith.constant 0 : index
        %111 = vector.load %arg15[%110, %c0_58, %c0_59] : memref<32x1x32xf32, #tpu.memory_space<vmem>>, vector<1x1x32xf32>
        %112 = vector.shape_cast %111 : vector<1x1x32xf32> to vector<1x32xf32>
        %cst_60 = arith.constant dense<0.000000e+00> : vector<1x96xf32>
        %113 = tpu.matmul %112, %74, %cst_60 {dimension_numbers = #tpu.dot_dimension_numbers<[1], [0], [0], [1], [0, 0, 1, 1], [], []>} : vector<1x32xf32>, vector<32x96xf32>, vector<1x96xf32> -> vector<1x96xf32>
        %114 = arith.addf %113, %75 : vector<1x96xf32>
        %c2_61 = arith.constant 2 : index
        %c0_62 = arith.constant 0 : index
        %c0_63 = arith.constant 0 : index
        %115 = vector.load %arg16[%c2_61, %c0_62, %c0_63] : memref<8x1x96xf32, #tpu.memory_space<vmem>>, vector<1x1x96xf32>
        %116 = vector.shape_cast %115 : vector<1x1x96xf32> to vector<1x96xf32>
        %117 = vector.shape_cast %114 : vector<1x96xf32> to vector<1x1x96xf32>
        tpu.vector_store %arg16[%c2_61, %c0_62, %c0_63], %117 {strides = array<i32>} : memref<8x1x96xf32, #tpu.memory_space<vmem>>, vector<1x1x96xf32>,
        %c3_i32 = arith.constant 3 : i32
        %118 = arith.cmpi sgt, %52, %c3_i32 : i32
        %119 = arith.addi %1, %55 : i32
        %c3_i32_64 = arith.constant 3 : i32
        %120 = arith.addi %119, %c3_i32_64 : i32
        %121 = arith.index_cast %120 : i32 to index
        %122 = memref.load %arg4[%121] : memref<80xi32, #tpu.memory_space<smem>>
        %c0_i32_65 = arith.constant 0 : i32
        %123 = arith.select %118, %122, %c0_i32_65 : i32
        %124 = arith.index_cast %123 : i32 to index
        %c0_66 = arith.constant 0 : index
        %c0_67 = arith.constant 0 : index
        %125 = vector.load %arg15[%124, %c0_66, %c0_67] : memref<32x1x32xf32, #tpu.memory_space<vmem>>, vector<1x1x32xf32>
        %126 = vector.shape_cast %125 : vector<1x1x32xf32> to vector<1x32xf32>
        %cst_68 = arith.constant dense<0.000000e+00> : vector<1x96xf32>
        %127 = tpu.matmul %126, %74, %cst_68 {dimension_numbers = #tpu.dot_dimension_numbers<[1], [0], [0], [1], [0, 0, 1, 1], [], []>} : vector<1x32xf32>, vector<32x96xf32>, vector<1x96xf32> -> vector<1x96xf32>
        %128 = arith.addf %127, %75 : vector<1x96xf32>
        %c3 = arith.constant 3 : index
        %c0_69 = arith.constant 0 : index
        %c0_70 = arith.constant 0 : index
        %129 = vector.load %arg16[%c3, %c0_69, %c0_70] : memref<8x1x96xf32, #tpu.memory_space<vmem>>, vector<1x1x96xf32>
        %130 = vector.shape_cast %129 : vector<1x1x96xf32> to vector<1x96xf32>
        %131 = vector.shape_cast %128 : vector<1x96xf32> to vector<1x1x96xf32>
        tpu.vector_store %arg16[%c3, %c0_69, %c0_70], %131 {strides = array<i32>} : memref<8x1x96xf32, #tpu.memory_space<vmem>>, vector<1x1x96xf32>,
        %c4_i32 = arith.constant 4 : i32
        %132 = arith.cmpi sgt, %52, %c4_i32 : i32
        %133 = arith.addi %1, %55 : i32
        %c4_i32_71 = arith.constant 4 : i32
        %134 = arith.addi %133, %c4_i32_71 : i32
        %135 = arith.index_cast %134 : i32 to index
        %136 = memref.load %arg4[%135] : memref<80xi32, #tpu.memory_space<smem>>
        %c0_i32_72 = arith.constant 0 : i32
        %137 = arith.select %132, %136, %c0_i32_72 : i32
        %138 = arith.index_cast %137 : i32 to index
        %c0_73 = arith.constant 0 : index
        %c0_74 = arith.constant 0 : index
        %139 = vector.load %arg15[%138, %c0_73, %c0_74] : memref<32x1x32xf32, #tpu.memory_space<vmem>>, vector<1x1x32xf32>
        %140 = vector.shape_cast %139 : vector<1x1x32xf32> to vector<1x32xf32>
        %cst_75 = arith.constant dense<0.000000e+00> : vector<1x96xf32>
        %141 = tpu.matmul %140, %74, %cst_75 {dimension_numbers = #tpu.dot_dimension_numbers<[1], [0], [0], [1], [0, 0, 1, 1], [], []>} : vector<1x32xf32>, vector<32x96xf32>, vector<1x96xf32> -> vector<1x96xf32>
        %142 = arith.addf %141, %75 : vector<1x96xf32>
        %c4 = arith.constant 4 : index
        %c0_76 = arith.constant 0 : index
        %c0_77 = arith.constant 0 : index
        %143 = vector.load %arg16[%c4, %c0_76, %c0_77] : memref<8x1x96xf32, #tpu.memory_space<vmem>>, vector<1x1x96xf32>
        %144 = vector.shape_cast %143 : vector<1x1x96xf32> to vector<1x96xf32>
        %145 = vector.shape_cast %142 : vector<1x96xf32> to vector<1x1x96xf32>
        tpu.vector_store %arg16[%c4, %c0_76, %c0_77], %145 {strides = array<i32>} : memref<8x1x96xf32, #tpu.memory_space<vmem>>, vector<1x1x96xf32>,
        %c5_i32 = arith.constant 5 : i32
        %146 = arith.cmpi sgt, %52, %c5_i32 : i32
        %147 = arith.addi %1, %55 : i32
        %c5_i32_78 = arith.constant 5 : i32
        %148 = arith.addi %147, %c5_i32_78 : i32
        %149 = arith.index_cast %148 : i32 to index
        %150 = memref.load %arg4[%149] : memref<80xi32, #tpu.memory_space<smem>>
        %c0_i32_79 = arith.constant 0 : i32
        %151 = arith.select %146, %150, %c0_i32_79 : i32
        %152 = arith.index_cast %151 : i32 to index
        %c0_80 = arith.constant 0 : index
        %c0_81 = arith.constant 0 : index
        %153 = vector.load %arg15[%152, %c0_80, %c0_81] : memref<32x1x32xf32, #tpu.memory_space<vmem>>, vector<1x1x32xf32>
        %154 = vector.shape_cast %153 : vector<1x1x32xf32> to vector<1x32xf32>
        %cst_82 = arith.constant dense<0.000000e+00> : vector<1x96xf32>
        %155 = tpu.matmul %154, %74, %cst_82 {dimension_numbers = #tpu.dot_dimension_numbers<[1], [0], [0], [1], [0, 0, 1, 1], [], []>} : vector<1x32xf32>, vector<32x96xf32>, vector<1x96xf32> -> vector<1x96xf32>
        %156 = arith.addf %155, %75 : vector<1x96xf32>
        %c5 = arith.constant 5 : index
        %c0_83 = arith.constant 0 : index
        %c0_84 = arith.constant 0 : index
        %157 = vector.load %arg16[%c5, %c0_83, %c0_84] : memref<8x1x96xf32, #tpu.memory_space<vmem>>, vector<1x1x96xf32>
        %158 = vector.shape_cast %157 : vector<1x1x96xf32> to vector<1x96xf32>
        %159 = vector.shape_cast %156 : vector<1x96xf32> to vector<1x1x96xf32>
        tpu.vector_store %arg16[%c5, %c0_83, %c0_84], %159 {strides = array<i32>} : memref<8x1x96xf32, #tpu.memory_space<vmem>>, vector<1x1x96xf32>,
        %c6_i32 = arith.constant 6 : i32
        %160 = arith.cmpi sgt, %52, %c6_i32 : i32
        %161 = arith.addi %1, %55 : i32
        %c6_i32_85 = arith.constant 6 : i32
        %162 = arith.addi %161, %c6_i32_85 : i32
        %163 = arith.index_cast %162 : i32 to index
        %164 = memref.load %arg4[%163] : memref<80xi32, #tpu.memory_space<smem>>
        %c0_i32_86 = arith.constant 0 : i32
        %165 = arith.select %160, %164, %c0_i32_86 : i32
        %166 = arith.index_cast %165 : i32 to index
        %c0_87 = arith.constant 0 : index
        %c0_88 = arith.constant 0 : index
        %167 = vector.load %arg15[%166, %c0_87, %c0_88] : memref<32x1x32xf32, #tpu.memory_space<vmem>>, vector<1x1x32xf32>
        %168 = vector.shape_cast %167 : vector<1x1x32xf32> to vector<1x32xf32>
        %cst_89 = arith.constant dense<0.000000e+00> : vector<1x96xf32>
        %169 = tpu.matmul %168, %74, %cst_89 {dimension_numbers = #tpu.dot_dimension_numbers<[1], [0], [0], [1], [0, 0, 1, 1], [], []>} : vector<1x32xf32>, vector<32x96xf32>, vector<1x96xf32> -> vector<1x96xf32>
        %170 = arith.addf %169, %75 : vector<1x96xf32>
        %c6 = arith.constant 6 : index
        %c0_90 = arith.constant 0 : index
        %c0_91 = arith.constant 0 : index
        %171 = vector.load %arg16[%c6, %c0_90, %c0_91] : memref<8x1x96xf32, #tpu.memory_space<vmem>>, vector<1x1x96xf32>
        %172 = vector.shape_cast %171 : vector<1x1x96xf32> to vector<1x96xf32>
        %173 = vector.shape_cast %170 : vector<1x96xf32> to vector<1x1x96xf32>
        tpu.vector_store %arg16[%c6, %c0_90, %c0_91], %173 {strides = array<i32>} : memref<8x1x96xf32, #tpu.memory_space<vmem>>, vector<1x1x96xf32>,
        %c7_i32 = arith.constant 7 : i32
        %174 = arith.cmpi sgt, %52, %c7_i32 : i32
        %175 = arith.addi %1, %55 : i32
        %c7_i32_92 = arith.constant 7 : i32
        %176 = arith.addi %175, %c7_i32_92 : i32
        %177 = arith.index_cast %176 : i32 to index
        %178 = memref.load %arg4[%177] : memref<80xi32, #tpu.memory_space<smem>>
        %c0_i32_93 = arith.constant 0 : i32
        %179 = arith.select %174, %178, %c0_i32_93 : i32
        %180 = arith.index_cast %179 : i32 to index
        %c0_94 = arith.constant 0 : index
        %c0_95 = arith.constant 0 : index
        %181 = vector.load %arg15[%180, %c0_94, %c0_95] : memref<32x1x32xf32, #tpu.memory_space<vmem>>, vector<1x1x32xf32>
        %182 = vector.shape_cast %181 : vector<1x1x32xf32> to vector<1x32xf32>
        %cst_96 = arith.constant dense<0.000000e+00> : vector<1x96xf32>
        %183 = tpu.matmul %182, %74, %cst_96 {dimension_numbers = #tpu.dot_dimension_numbers<[1], [0], [0], [1], [0, 0, 1, 1], [], []>} : vector<1x32xf32>, vector<32x96xf32>, vector<1x96xf32> -> vector<1x96xf32>
        %184 = arith.addf %183, %75 : vector<1x96xf32>
        %c7 = arith.constant 7 : index
        %c0_97 = arith.constant 0 : index
        %c0_98 = arith.constant 0 : index
        %185 = vector.load %arg16[%c7, %c0_97, %c0_98] : memref<8x1x96xf32, #tpu.memory_space<vmem>>, vector<1x1x96xf32>
        %186 = vector.shape_cast %185 : vector<1x1x96xf32> to vector<1x96xf32>
        %187 = vector.shape_cast %184 : vector<1x96xf32> to vector<1x1x96xf32>
        tpu.vector_store %arg16[%c7, %c0_97, %c0_98], %187 {strides = array<i32>} : memref<8x1x96xf32, #tpu.memory_space<vmem>>, vector<1x1x96xf32>,
      } else {
      }
      %cst_24 = arith.constant 0.000000e+00 : f32
      %59 = vector.broadcast %cst_24 : f32 to vector<1x32xf32>
      %c0_i32_25 = arith.constant 0 : i32
      %60 = arith.subi %52, %c0_i32_25 : i32
      %61 = arith.addi %c0_i32_25, %60 : i32
      %c1_i32_26 = arith.constant 1 : i32
      %62 = scf.for %arg18 = %c0_i32_25 to %61 step %c1_i32_26 iter_args(%arg19 = %59) -> (vector<1x32xf32>)  : i32 {
        %74 = arith.index_cast %arg18 : i32 to index
        %c0_34 = arith.constant 0 : index
        %c0_35 = arith.constant 0 : index
        %75 = vector.load %arg16[%74, %c0_34, %c0_35] : memref<8x1x96xf32, #tpu.memory_space<vmem>>, vector<1x1x96xf32>
        %76 = vector.shape_cast %75 : vector<1x1x96xf32> to vector<1x96xf32>
        %c0_36 = arith.constant 0 : index
        %c0_37 = arith.constant 0 : index
        %77 = vector.load %arg10[%c0_36, %c0_37] : memref<32x96xf32, #tpu.memory_space<vmem>>, vector<32x96xf32>
        %cst_38 = arith.constant dense<0.000000e+00> : vector<1x96xf32>
        %78 = tpu.matmul %arg19, %77, %cst_38 {dimension_numbers = #tpu.dot_dimension_numbers<[1], [0], [0], [1], [0, 0, 1, 1], [], []>} : vector<1x32xf32>, vector<32x96xf32>, vector<1x96xf32> -> vector<1x96xf32>
        %79 = vector.extract_strided_slice %76 {offsets = [0, 0], sizes = [1, 32], strides = [1, 1]} : vector<1x96xf32> to vector<1x32xf32>
        %80 = vector.extract_strided_slice %78 {offsets = [0, 0], sizes = [1, 32], strides = [1, 1]} : vector<1x96xf32> to vector<1x32xf32>
        %81 = arith.addf %79, %80 : vector<1x32xf32>
        %82 = arith.negf %81 : vector<1x32xf32>
        %83 = math.exp %82 : vector<1x32xf32>
        %cst_39 = arith.constant 1.000000e+00 : f32
        %84 = vector.broadcast %cst_39 : f32 to vector<1x32xf32>
        %85 = arith.addf %84, %83 : vector<1x32xf32>
        %86 = arith.divf %84, %85 : vector<1x32xf32>
        %87 = vector.extract_strided_slice %76 {offsets = [0, 32], sizes = [1, 32], strides = [1, 1]} : vector<1x96xf32> to vector<1x32xf32>
        %88 = vector.extract_strided_slice %78 {offsets = [0, 32], sizes = [1, 32], strides = [1, 1]} : vector<1x96xf32> to vector<1x32xf32>
        %89 = arith.addf %87, %88 : vector<1x32xf32>
        %90 = arith.negf %89 : vector<1x32xf32>
        %91 = math.exp %90 : vector<1x32xf32>
        %cst_40 = arith.constant 1.000000e+00 : f32
        %92 = vector.broadcast %cst_40 : f32 to vector<1x32xf32>
        %93 = arith.addf %92, %91 : vector<1x32xf32>
        %94 = arith.divf %92, %93 : vector<1x32xf32>
        %95 = vector.extract_strided_slice %76 {offsets = [0, 64], sizes = [1, 32], strides = [1, 1]} : vector<1x96xf32> to vector<1x32xf32>
        %96 = vector.extract_strided_slice %78 {offsets = [0, 64], sizes = [1, 32], strides = [1, 1]} : vector<1x96xf32> to vector<1x32xf32>
        %c0_41 = arith.constant 0 : index
        %c0_42 = arith.constant 0 : index
        %97 = vector.load %arg11[%c0_41, %c0_42] : memref<1x32xf32, #tpu.memory_space<vmem>>, vector<1x32xf32>
        %98 = arith.addf %96, %97 : vector<1x32xf32>
        %99 = arith.mulf %86, %98 : vector<1x32xf32>
        %100 = arith.addf %95, %99 : vector<1x32xf32>
        %101 = math.tanh %100 : vector<1x32xf32>
        %cst_43 = arith.constant 1.000000e+00 : f32
        %102 = vector.broadcast %cst_43 : f32 to vector<1x32xf32>
        %103 = arith.subf %102, %94 : vector<1x32xf32>
        %104 = arith.mulf %103, %101 : vector<1x32xf32>
        %105 = arith.mulf %94, %arg19 : vector<1x32xf32>
        %106 = arith.addf %104, %105 : vector<1x32xf32>
        scf.yield %106 : vector<1x32xf32>
      }
      %63 = arith.index_cast %49 : i32 to index
      %c0_27 = arith.constant 0 : index
      %c0_28 = arith.constant 0 : index
      %64 = vector.load %arg6[%63, %c0_27, %c0_28] : memref<20x1x32xf32, #tpu.memory_space<vmem>>, vector<1x1x32xf32>
      %65 = vector.shape_cast %64 : vector<1x1x32xf32> to vector<1x32xf32>
      %c0_29 = arith.constant 0 : index
      %c0_30 = arith.constant 0 : index
      %66 = vector.load %arg7[%c0_29, %c0_30] : memref<32x32xf32, #tpu.memory_space<vmem>>, vector<32x32xf32>
      %cst_31 = arith.constant dense<0.000000e+00> : vector<1x32xf32>
      %67 = tpu.matmul %62, %66, %cst_31 {dimension_numbers = #tpu.dot_dimension_numbers<[1], [0], [0], [1], [0, 0, 1, 1], [], []>} : vector<1x32xf32>, vector<32x32xf32>, vector<1x32xf32> -> vector<1x32xf32>
      %68 = arith.addf %65, %67 : vector<1x32xf32>
      %69 = math.tanh %68 : vector<1x32xf32>
      %70 = arith.index_cast %arg17 : i32 to index
      %c0_32 = arith.constant 0 : index
      %c0_33 = arith.constant 0 : index
      %71 = vector.load %arg15[%70, %c0_32, %c0_33] : memref<32x1x32xf32, #tpu.memory_space<vmem>>, vector<1x1x32xf32>
      %72 = vector.shape_cast %71 : vector<1x1x32xf32> to vector<1x32xf32>
      %73 = vector.shape_cast %69 : vector<1x32xf32> to vector<1x1x32xf32>
      tpu.vector_store %arg15[%70, %c0_32, %c0_33], %73 {strides = array<i32>} : memref<32x1x32xf32, #tpu.memory_space<vmem>>, vector<1x1x32xf32>,
    }
    %c1_i32_1 = arith.constant 1 : i32
    %6 = arith.subi %3, %c1_i32_1 : i32
    %7 = arith.index_cast %6 : i32 to index
    %c0 = arith.constant 0 : index
    %c0_2 = arith.constant 0 : index
    %8 = vector.load %arg15[%7, %c0, %c0_2] : memref<32x1x32xf32, #tpu.memory_space<vmem>>, vector<1x1x32xf32>
    %9 = vector.shape_cast %8 : vector<1x1x32xf32> to vector<1x32xf32>
    %c0_3 = arith.constant 0 : index
    %c0_4 = arith.constant 0 : index
    %10 = vector.load %arg12[%c0_3, %c0_4] : memref<32x28xf32, #tpu.memory_space<vmem>>, vector<32x28xf32>
    %cst = arith.constant dense<0.000000e+00> : vector<1x28xf32>
    %11 = tpu.matmul %9, %10, %cst {dimension_numbers = #tpu.dot_dimension_numbers<[1], [0], [0], [1], [0, 0, 1, 1], [], []>} : vector<1x32xf32>, vector<32x28xf32>, vector<1x28xf32> -> vector<1x28xf32>
    %c0_5 = arith.constant 0 : index
    %c0_6 = arith.constant 0 : index
    %12 = vector.load %arg13[%c0_5, %c0_6] : memref<1x28xf32, #tpu.memory_space<vmem>>, vector<1x28xf32>
    %13 = arith.addf %11, %12 : vector<1x28xf32>
    %14 = vector.extract_strided_slice %13 {offsets = [0, 0], sizes = [1, 20], strides = [1, 1]} : vector<1x28xf32> to vector<1x20xf32>
    %cst_7 = arith.constant dense<0xFF800000> : vector<1xf32>
    %15 = vector.multi_reduction <maximumf>, %14, %cst_7 [1] : vector<1x20xf32> to vector<1xf32>
    %16 = vector.shape_cast %15 : vector<1xf32> to vector<1x1xf32>
    %17 = vector.broadcast %16 : vector<1x1xf32> to vector<1x20xf32>
    %18 = arith.subf %14, %17 : vector<1x20xf32>
    %19 = math.exp %18 : vector<1x20xf32>
    %cst_8 = arith.constant dense<0.000000e+00> : vector<1xf32>
    %20 = vector.multi_reduction <add>, %19, %cst_8 [1] : vector<1x20xf32> to vector<1xf32>
    %21 = vector.shape_cast %20 : vector<1xf32> to vector<1x1xf32>
    %22 = vector.broadcast %21 : vector<1x1xf32> to vector<1x20xf32>
    %23 = arith.divf %19, %22 : vector<1x20xf32>
    %24 = vector.extract_strided_slice %13 {offsets = [0, 20], sizes = [1, 8], strides = [1, 1]} : vector<1x28xf32> to vector<1x8xf32>
    %cst_9 = arith.constant dense<0xFF800000> : vector<1xf32>
    %25 = vector.multi_reduction <maximumf>, %24, %cst_9 [1] : vector<1x8xf32> to vector<1xf32>
    %26 = vector.shape_cast %25 : vector<1xf32> to vector<1x1xf32>
    %27 = vector.broadcast %26 : vector<1x1xf32> to vector<1x8xf32>
    %28 = arith.subf %24, %27 : vector<1x8xf32>
    %29 = math.exp %28 : vector<1x8xf32>
    %cst_10 = arith.constant dense<0.000000e+00> : vector<1xf32>
    %30 = vector.multi_reduction <add>, %29, %cst_10 [1] : vector<1x8xf32> to vector<1xf32>
    %31 = vector.shape_cast %30 : vector<1xf32> to vector<1x1xf32>
    %32 = vector.broadcast %31 : vector<1x1xf32> to vector<1x8xf32>
    %33 = arith.divf %29, %32 : vector<1x8xf32>
    %cst_11 = arith.constant 0.000000e+00 : f32
    %34 = vector.broadcast %cst_11 : f32 to vector<8x128xf32>
    %c0_12 = arith.constant 0 : index
    %c0_13 = arith.constant 0 : index
    %c0_14 = arith.constant 0 : index
    %35 = vector.load %arg14[%c0_12, %c0_13, %c0_14] : memref<1x8x128xf32, #tpu.memory_space<vmem>>, vector<1x8x128xf32>
    %36 = vector.shape_cast %35 : vector<1x8x128xf32> to vector<8x128xf32>
    %37 = vector.shape_cast %34 : vector<8x128xf32> to vector<1x8x128xf32>
    tpu.vector_store %arg14[%c0_12, %c0_13, %c0_14], %37 {strides = array<i32>} : memref<1x8x128xf32, #tpu.memory_space<vmem>>, vector<1x8x128xf32>,
    %c0_15 = arith.constant 0 : index
    %c0_16 = arith.constant 0 : index
    %c0_17 = arith.constant 0 : index
    %38 = vector.load %arg14[%c0_15, %c0_16, %c0_17] : memref<1x8x128xf32, #tpu.memory_space<vmem>>, vector<1x1x32xf32>
    %39 = vector.shape_cast %38 : vector<1x1x32xf32> to vector<1x32xf32>
    %40 = vector.shape_cast %9 : vector<1x32xf32> to vector<1x1x32xf32>
    tpu.vector_store %arg14[%c0_15, %c0_16, %c0_17], %40 {strides = array<i32>} : memref<1x8x128xf32, #tpu.memory_space<vmem>>, vector<1x1x32xf32>,
    %c0_18 = arith.constant 0 : index
    %c1 = arith.constant 1 : index
    %c0_19 = arith.constant 0 : index
    %41 = vector.load %arg14[%c0_18, %c1, %c0_19] : memref<1x8x128xf32, #tpu.memory_space<vmem>>, vector<1x1x20xf32>
    %42 = vector.shape_cast %41 : vector<1x1x20xf32> to vector<1x20xf32>
    %43 = vector.shape_cast %23 : vector<1x20xf32> to vector<1x1x20xf32>
    tpu.vector_store %arg14[%c0_18, %c1, %c0_19], %43 {strides = array<i32>} : memref<1x8x128xf32, #tpu.memory_space<vmem>>, vector<1x1x20xf32>,
    %c0_20 = arith.constant 0 : index
    %c2 = arith.constant 2 : index
    %c0_21 = arith.constant 0 : index
    %44 = vector.load %arg14[%c0_20, %c2, %c0_21] : memref<1x8x128xf32, #tpu.memory_space<vmem>>, vector<1x1x8xf32>
    %45 = vector.shape_cast %44 : vector<1x1x8xf32> to vector<1x8xf32>
    %46 = vector.shape_cast %33 : vector<1x8xf32> to vector<1x1x8xf32>
    tpu.vector_store %arg14[%c0_20, %c2, %c0_21], %46 {strides = array<i32>} : memref<1x8x128xf32, #tpu.memory_space<vmem>>, vector<1x1x8xf32>,
    return
  }
  func.func @transform_0(%arg0: i32, %arg1: memref<64xi32, #tpu.memory_space<smem>>, %arg2: memref<64xi32, #tpu.memory_space<smem>>, %arg3: memref<64xi32, #tpu.memory_space<smem>>, %arg4: memref<80xi32, #tpu.memory_space<smem>>, %arg5: memref<2xi32, #tpu.memory_space<smem>>) -> (i32, i32, i32) {
    %c0_i32 = arith.constant 0 : i32
    %c0_i32_0 = arith.constant 0 : i32
    %c0_i32_1 = arith.constant 0 : i32
    %c0_i32_2 = arith.constant 0 : i32
    return %c0_i32, %c0_i32_0, %c0_i32_1 : i32, i32, i32
  }
  func.func @transform_1(%arg0: i32, %arg1: memref<64xi32, #tpu.memory_space<smem>>, %arg2: memref<64xi32, #tpu.memory_space<smem>>, %arg3: memref<64xi32, #tpu.memory_space<smem>>, %arg4: memref<80xi32, #tpu.memory_space<smem>>, %arg5: memref<2xi32, #tpu.memory_space<smem>>) -> (i32, i32) {
    %c0_i32 = arith.constant 0 : i32
    %c0_i32_0 = arith.constant 0 : i32
    %c0_i32_1 = arith.constant 0 : i32
    return %c0_i32, %c0_i32_0 : i32, i32
  }
  func.func @transform_2(%arg0: i32, %arg1: memref<64xi32, #tpu.memory_space<smem>>, %arg2: memref<64xi32, #tpu.memory_space<smem>>, %arg3: memref<64xi32, #tpu.memory_space<smem>>, %arg4: memref<80xi32, #tpu.memory_space<smem>>, %arg5: memref<2xi32, #tpu.memory_space<smem>>) -> (i32, i32) {
    %c0_i32 = arith.constant 0 : i32
    %c0_i32_0 = arith.constant 0 : i32
    %c0_i32_1 = arith.constant 0 : i32
    return %c0_i32, %c0_i32_0 : i32, i32
  }
  func.func @transform_3(%arg0: i32, %arg1: memref<64xi32, #tpu.memory_space<smem>>, %arg2: memref<64xi32, #tpu.memory_space<smem>>, %arg3: memref<64xi32, #tpu.memory_space<smem>>, %arg4: memref<80xi32, #tpu.memory_space<smem>>, %arg5: memref<2xi32, #tpu.memory_space<smem>>) -> (i32, i32) {
    %c0_i32 = arith.constant 0 : i32
    %c0_i32_0 = arith.constant 0 : i32
    %c0_i32_1 = arith.constant 0 : i32
    return %c0_i32, %c0_i32_0 : i32, i32
  }
  func.func @transform_4(%arg0: i32, %arg1: memref<64xi32, #tpu.memory_space<smem>>, %arg2: memref<64xi32, #tpu.memory_space<smem>>, %arg3: memref<64xi32, #tpu.memory_space<smem>>, %arg4: memref<80xi32, #tpu.memory_space<smem>>, %arg5: memref<2xi32, #tpu.memory_space<smem>>) -> (i32, i32) {
    %c0_i32 = arith.constant 0 : i32
    %c0_i32_0 = arith.constant 0 : i32
    %c0_i32_1 = arith.constant 0 : i32
    return %c0_i32, %c0_i32_0 : i32, i32
  }
  func.func @transform_5(%arg0: i32, %arg1: memref<64xi32, #tpu.memory_space<smem>>, %arg2: memref<64xi32, #tpu.memory_space<smem>>, %arg3: memref<64xi32, #tpu.memory_space<smem>>, %arg4: memref<80xi32, #tpu.memory_space<smem>>, %arg5: memref<2xi32, #tpu.memory_space<smem>>) -> (i32, i32) {
    %c0_i32 = arith.constant 0 : i32
    %c0_i32_0 = arith.constant 0 : i32
    %c0_i32_1 = arith.constant 0 : i32
    return %c0_i32, %c0_i32_0 : i32, i32
  }
  func.func @transform_6(%arg0: i32, %arg1: memref<64xi32, #tpu.memory_space<smem>>, %arg2: memref<64xi32, #tpu.memory_space<smem>>, %arg3: memref<64xi32, #tpu.memory_space<smem>>, %arg4: memref<80xi32, #tpu.memory_space<smem>>, %arg5: memref<2xi32, #tpu.memory_space<smem>>) -> (i32, i32) {
    %c0_i32 = arith.constant 0 : i32
    %c0_i32_0 = arith.constant 0 : i32
    %c0_i32_1 = arith.constant 0 : i32
    return %c0_i32, %c0_i32_0 : i32, i32
  }
  func.func @transform_7(%arg0: i32, %arg1: memref<64xi32, #tpu.memory_space<smem>>, %arg2: memref<64xi32, #tpu.memory_space<smem>>, %arg3: memref<64xi32, #tpu.memory_space<smem>>, %arg4: memref<80xi32, #tpu.memory_space<smem>>, %arg5: memref<2xi32, #tpu.memory_space<smem>>) -> (i32, i32) {
    %c0_i32 = arith.constant 0 : i32
    %c0_i32_0 = arith.constant 0 : i32
    %c0_i32_1 = arith.constant 0 : i32
    return %c0_i32, %c0_i32_0 : i32, i32
  }
  func.func @transform_8(%arg0: i32, %arg1: memref<64xi32, #tpu.memory_space<smem>>, %arg2: memref<64xi32, #tpu.memory_space<smem>>, %arg3: memref<64xi32, #tpu.memory_space<smem>>, %arg4: memref<80xi32, #tpu.memory_space<smem>>, %arg5: memref<2xi32, #tpu.memory_space<smem>>) -> (i32, i32, i32) {
    %c0_i32 = arith.constant 0 : i32
    %c0_i32_0 = arith.constant 0 : i32
    %c0_i32_1 = arith.constant 0 : i32
    return %arg0, %c0_i32, %c0_i32_0 : i32, i32, i32
  }
}

</mosaic_0001>

<bundles_post_ra>
// kernel: _rvnn_forward.1
= control target key start
LH: loop header
LB: loop body
LE: loop exit
PB: predicated region body
PF: predicated region fallthrough
CT: control target
= control target key end

     0   :  { %s2752_s0 = inlined_call_operand.hbm [shape: s32[64], index: 0, kind: input, shape index: {}]   ;;  %s2753_s5 = inlined_call_operand.hbm [shape: f32[20,1,32], index: 5, kind: input, shape index: {}]   ;;  %s2754_s6 = inlined_call_operand.vmem [shape: f32[32,32], index: 6, kind: input, shape index: {}]   ;;  %s2755_s7 = inlined_call_operand.hbm [shape: f32[32,96], index: 7, kind: input, shape index: {}]   ;;  %s2756_s8 = inlined_call_operand.vmem [shape: f32[1,96], index: 8, kind: input, shape index: {}]   ;;  %s2757_s9 = inlined_call_operand.hbm [shape: f32[32,96], index: 9, kind: input, shape index: {}]   ;;  %s2758_s10 = inlined_call_operand.hbm [shape: f32[1,32], index: 10, kind: input, shape index: {}]   ;;  %s2759_s11 = inlined_call_operand.hbm [shape: f32[32,28], index: 11, kind: input, shape index: {}]   ;;  %s2760_s12 = inlined_call_operand.hbm [shape: f32[1,28], index: 12, kind: input, shape index: {}]   ;;  %s2761_s13 = inlined_call_operand.vmem [shape: f32[2,8,128], index: 13, kind: output, shape index: {}]   ;;  %s2762_s1 = inlined_call_operand.vmem [shape: s32[64], index: 1, kind: input, shape index: {}]   ;;  %s2763_s2 = inlined_call_operand.vmem [shape: s32[64], index: 2, kind: input, shape index: {}]   ;;  %s2764_s3 = inlined_call_operand.vmem [shape: s32[80], index: 3, kind: input, shape index: {}]   ;;  %s2765_s4 = inlined_call_operand.vmem [shape: s32[2], index: 4, kind: input, shape index: {}]  }
   0x1   :  { %s1968_s27 = scalar_lea.hbm %s2752_s0, 16 }
   0x2   :  { %p1969_p0 = scmp.ne.s32.totalorder %s2752_s0, %s1968_s27  ;;  %p1972_p1 = scmp.lt.u32.totalorder %s1968_s27, %s2752_s0 }
   0x4   :  { %p1974_p2 = pnand %p1972_p1, %p1969_p0 }
   0x6   :  { %1977 = shalt.err (!%p1974_p2)  }
   0x7   :  { %s2252_s15 = smov [#allocation5]   ;;  %s20_s20 = sshll.u32 %s2762_s1, 4  ;;  %s21_s20 = int_to_ptr.vmem [resolvable:$true] %s20_s20 }
   0x8   :  { %19 = dma.hbm_to_smem %s2752_s0, 16, %s2252_s15, [#allocation4] }
   0x9   :  { %s24_s23 = sshll.u32 %s2763_s2, 4  ;;  %s1978_s24 = scalar_lea.vmem %s21_s20, 16  ;;  %s25_s23 = int_to_ptr.vmem [resolvable:$true] %s24_s23 }
   0xa   :  { %p1979_p3 = scmp.ne.s32.totalorder %s21_s20, %s1978_s24  ;;  %p1983_p4 = scmp.lt.s32.totalorder %s21_s20, %s21_s20 }
   0xb   :  { %p1984_p5 = scmp.lt.s32.totalorder %s1978_s24, %s1978_s24 }
   0xd   :  { %p1985_p6 = por %p1984_p5, %p1983_p4 }
   0xf   :  { %p1986_p7 = pnand %p1985_p6, %p1979_p3 }
  0x11   :  { %1989 = shalt.err (!%p1986_p7)  }
  0x12   :  { %s2253_s25 = smov [#allocation6]   ;;  %s28_s27 = sshll.u32 %s2764_s3, 4  ;;  %s29_s27 = int_to_ptr.vmem [resolvable:$true] %s28_s27 }
  0x13   :  { %23 = dma.vmem_to_smem %s21_s20, 16, %s2253_s25, [#allocation4] }
  0x14   :  { %s1990_s1 = scalar_lea.vmem %s25_s23, 16  ;;  %p1995_p9 = scmp.lt.s32.totalorder %s25_s23, %s25_s23 }
  0x15   :  { %p1991_p8 = scmp.ne.s32.totalorder %s25_s23, %s1990_s1  ;;  %p1996_p10 = scmp.lt.s32.totalorder %s1990_s1, %s1990_s1 }
  0x17   :  { %p1997_p11 = por %p1996_p10, %p1995_p9 }
  0x19   :  { %p1998_p12 = pnand %p1997_p11, %p1991_p8 }
  0x1b   :  { %2001 = shalt.err (!%p1998_p12)  }
  0x1c   :  { %s2254_s2 = smov [#allocation7]   ;;  %s2002_s28 = scalar_lea.vmem %s29_s27, 16 }
  0x1d   :  { %27 = dma.vmem_to_smem %s25_s23, 16, %s2254_s2, [#allocation4] }
  0x1e   :  { %p2003_p13 = scmp.ne.s32.totalorder %s29_s27, %s2002_s28  ;;  %p2007_p0 = scmp.lt.s32.totalorder %s29_s27, %s29_s27 }
  0x1f   :  { %p2008_p1 = scmp.lt.s32.totalorder %s2002_s28, %s2002_s28 }
  0x21   :  { %p2009_p2 = por %p2008_p1, %p2007_p0 }
  0x23   :  { %p2010_p3 = pnand %p2009_p2, %p2003_p13 }
  0x25   :  { %2013 = shalt.err (!%p2010_p3)  }
  0x26   :  { %s2255_s29 = smov [#allocation8]   ;;  %s32_s14 = sshll.u32 %s2765_s4, 4  ;;  %s33_s14 = int_to_ptr.vmem [resolvable:$true] %s32_s14 }
  0x27   :  { %31 = dma.vmem_to_smem %s29_s27, 16, %s2255_s29, [#allocation4] }
  0x28   :  { %s2014_s15 = scalar_lea.vmem %s33_s14, 16  ;;  %p2019_p5 = scmp.lt.s32.totalorder %s33_s14, %s33_s14 }
  0x29   :  { %p2015_p4 = scmp.ne.s32.totalorder %s33_s14, %s2014_s15  ;;  %p2020_p6 = scmp.lt.s32.totalorder %s2014_s15, %s2014_s15 }
  0x2b   :  { %p2021_p7 = por %p2020_p6, %p2019_p5 }
  0x2d   :  { %p2022_p8 = pnand %p2021_p7, %p2015_p4 }
  0x2f   :  { %2025 = shalt.err (!%p2022_p8)  }
  0x30   :  { %s2256_s16 = smov [#allocation9]  }
  0x31   :  { %35 = dma.vmem_to_smem %s33_s14, 16, %s2256_s16, [#allocation4] }
  0x32   :  { %2214 = dma.done.wait [#allocation4], 80 }
  0x33   :  { %2215 = vsyncadd [#allocation4], 4294967216 }
  0x34   :  { %37 = sfence }
  0x35   :  { %38 = vsyncpa [#allocation11], 0 }
  0x36   :  { %39 = vsyncpa [#allocation13], 0 }
  0x37   :  { %40 = vsyncpa [#allocation16], 0 }
  0x38   :  { %41 = vsyncpa [#allocation19], 0  ;;  %s2378_s17 = smov 0  }
  0x39 LB: > { %s2257_s4 = smov [#allocation12]   ;;  %s2384_s19 = sadd.s32 4294967295, %s2234_s17   ;;  %s2234_s17 = sphi %s2378_s17, %s47_s17  }
  0x3a   : > { %s274_s18 = sshll.u32 %s2257_s4, 4  ;;  %p1544_p9 = scmp.ge.s32.totalorder %s2234_s17, 1  ;;  %s2389_s18 = int_to_ptr.vmem [resolvable:$true] %s274_s18 }
  0x3b   : > { %p246_p10 = scmp.lt.s32.totalorder %s2234_s17, 3  ;;  %p2766_p11 = scmp.eq.s32.totalorder %s2384_s19, 0 }
  0x3c   : > { %s2258_s21 = smov [#allocation15]   ;;  %s2259_s24 = smov [#allocation10]  }
  0x3d   : > { %p2391_p12 = pnand %p1544_p9, %p246_p10  ;;  %s304_s22 = sshll.u32 %s2258_s21, 4  ;;  %s2397_s22 = int_to_ptr.vmem [resolvable:$true] %s304_s22 }
  0x3e   : > { %s258_s25 = sshll.u32 %s2259_s24, 4  ;;  %s2026_s27 = scalar_lea.hbm %s2755_s7, 512  ;;  %s2405_s25 = int_to_ptr.vmem [resolvable:$true] %s258_s25 }
  0x3f   : > { %s2768_s20 = scalar_select %p2391_p12, 1, 0 }
  0x40   : > { %p1849_p13 = pneg %p2391_p12  ;;  %p2027_p1 = scmp.ne.s32.totalorder %s2755_s7, %s2026_s27 }
  0x41   : > { %p2033_p5 = scmp.lt.u32.totalorder %s2026_s27, %s2755_s7 }
  0x42   : > { %p2401_p0 = pnand %p2766_p11, %p1849_p13 }
  0x44   : > { %p2415_p2 = pneg %p2401_p0 }
  0x46   : > { %p2029_p3 = pnand %p2415_p2, %p2027_p1 }
  0x48   : > { %p2030_p4 = pneg %p2029_p3 }
  0x4a   : > { %p2035_p6 = pnand %p2033_p5, %p2030_p4 }
  0x4c   : > { %2038 = shalt.err (!%p2035_p6)
}
  0x4d   : > { %s2039_s30 = scalar_lea.vmem %s2389_s18, 512  ;;  %p2047_p10 = scmp.lt.s32.totalorder %s2389_s18, %s2389_s18 }
  0x4e   : > { %p2040_p7 = scmp.ne.s32.totalorder %s2389_s18, %s2039_s30  ;;  %p2048_p13 = scmp.lt.s32.totalorder %s2039_s30, %s2039_s30 }
  0x50   : > { %p2042_p8 = pnand %p2040_p7, %p2415_p2  ;;  %p2049_p1 = por %p2048_p13, %p2047_p10 }
  0x52   : > { %p2043_p9 = pneg %p2042_p8 }
  0x54   : > { %p2050_p3 = pnand %p2049_p1, %p2043_p9 }
  0x56   : > { %2053 = shalt.err (!%p2050_p3)
}
  0x57   : > { %s2260_s14 = smov 128   ;;  %s2261_s15 = smov 8  }
  0x58   : > { %1855 = dma.hbm_to_vmem [thread:$0]  (!%p2401_p0), %s2755_s7, 512, %s2389_s18, [#allocation13], %s2260_s14, %s2260_s14, %s2261_s15  }
  0x59   : > { %s2054_s0 = scalar_lea.hbm %s2758_s10, 16 }
  0x5a   : > { %p2055_p4 = scmp.ne.s32.totalorder %s2758_s10, %s2054_s0  ;;  %p2061_p7 = scmp.lt.u32.totalorder %s2054_s0, %s2758_s10 }
  0x5c   : > { %p2057_p5 = pnand %p2055_p4, %p2415_p2 }
  0x5e   : > { %p2058_p6 = pneg %p2057_p5 }
  0x60   : > { %p2063_p8 = pnand %p2061_p7, %p2058_p6 }
  0x62   : > { %2066 = shalt.err (!%p2063_p8)
}
  0x63   : > { %s2067_s18 = scalar_lea.vmem %s2397_s22, 16  ;;  %s2074_s29 = scalar_lea.vmem %s2397_s22, 32 }
  0x64   : > { %p2068_p9 = scmp.ne.s32.totalorder %s2397_s22, %s2067_s18  ;;  %p2075_p1 = scmp.lt.s32.totalorder %s2397_s22, %s2397_s22 }
  0x65   : > { %p2076_p3 = scmp.lt.s32.totalorder %s2074_s29, %s2067_s18 }
  0x66   : > { %p2070_p10 = pnand %p2068_p9, %p2415_p2 }
  0x67   : > { %p2077_p4 = por %p2076_p3, %p2075_p1 }
  0x68   : > { %p2071_p13 = pneg %p2070_p10 }
  0x6a   : > { %p2078_p5 = pnand %p2077_p4, %p2071_p13 }
  0x6c   : > { %2081 = shalt.err (!%p2078_p5)
}
  0x6d   : > { %1861 = dma.hbm_to_vmem [thread:$0]  (!%p2401_p0), %s2758_s10, 16, %s2397_s22, [#allocation16]  }
  0x6e   : > { %s2082_s21 = scalar_lea.hbm %s2753_s5, 320 }
  0x6f   : > { %p2083_p6 = scmp.ne.s32.totalorder %s2753_s5, %s2082_s21  ;;  %p2089_p9 = scmp.lt.u32.totalorder %s2082_s21, %s2753_s5 }
  0x71   : > { %p2085_p7 = pnand %p2083_p6, %p2415_p2 }
  0x73   : > { %p2086_p8 = pneg %p2085_p7 }
  0x75   : > { %p2091_p10 = pnand %p2089_p9, %p2086_p8 }
  0x77   : > { %2094 = shalt.err (!%p2091_p10)
}
  0x78   : > { %s2095_s22 = scalar_lea.vmem %s2405_s25, 320  ;;  %p2103_p4 = scmp.lt.s32.totalorder %s2405_s25, %s2405_s25 }
  0x79   : > { %p2096_p13 = scmp.ne.s32.totalorder %s2405_s25, %s2095_s22  ;;  %p2104_p5 = scmp.lt.s32.totalorder %s2095_s22, %s2095_s22 }
  0x7b   : > { %p2098_p1 = pnand %p2096_p13, %p2415_p2  ;;  %p2105_p6 = por %p2104_p5, %p2103_p4 }
  0x7d   : > { %p2099_p3 = pneg %p2098_p1 }
  0x7f   : > { %p2106_p7 = pnand %p2105_p6, %p2099_p3 }
  0x81   : > { %2109 = shalt.err (!%p2106_p7)
}
  0x82   : > { %s2262_s1 = smov 16   ;;  %s2263_s2 = smov 1  }
  0x83   : > { %1852 = dma.hbm_to_vmem [thread:$0]  (!%p2401_p0), %s2753_s5, 320, %s2405_s25, [#allocation11], %s2262_s1, %s2262_s1, %s2263_s2  }
  0x84   : > { %s2264_s3 = smov [#allocation14]   ;;  %s2265_s16 = smov [#allocation17]  }
  0x85   : > { %s290_s30 = sshll.u32 %s2264_s3, 4  ;;  %s314_s4 = sshll.u32 %s2265_s16, 4  ;;  %s291_s30 = int_to_ptr.vmem [resolvable:$true] %s290_s30  ;;  %s2486_s4 = int_to_ptr.vmem [resolvable:$true] %s314_s4 }
  0x86   : > { %s2110_s0 = scalar_lea.hbm %s2757_s9, 512 }
  0x87   : > { %p2111_p8 = scmp.ne.s32.totalorder %s2757_s9, %s2110_s0  ;;  %p2117_p13 = scmp.lt.u32.totalorder %s2110_s0, %s2757_s9 }
  0x89   : > { %p2113_p9 = pnand %p2111_p8, %p2415_p2 }
  0x8b   : > { %p2114_p10 = pneg %p2113_p9 }
  0x8d   : > { %p2119_p1 = pnand %p2117_p13, %p2114_p10 }
  0x8f   : > { %2122 = shalt.err (!%p2119_p1)
}
  0x90   : > { %s2123_s1 = scalar_lea.vmem %s291_s30, 512  ;;  %p2131_p6 = scmp.lt.s32.totalorder %s291_s30, %s291_s30 }
  0x91   : > { %p2124_p3 = scmp.ne.s32.totalorder %s291_s30, %s2123_s1  ;;  %p2132_p7 = scmp.lt.s32.totalorder %s2123_s1, %s2123_s1 }
  0x93   : > { %p2126_p4 = pnand %p2124_p3, %p2415_p2  ;;  %p2133_p11 = por %p2132_p7, %p2131_p6 }
  0x95   : > { %p2127_p5 = pneg %p2126_p4 }
  0x97   : > { %p2134_p12 = pnand %p2133_p11, %p2127_p5 }
  0x99   : > { %2137 = shalt.err (!%p2134_p12)
}
  0x9a   : > { %1858 = dma.hbm_to_vmem [thread:$0]  (!%p2401_p0), %s2757_s9, 512, %s291_s30, [#allocation13], %s2260_s14, %s2260_s14, %s2261_s15  }
  0x9b   : > { %s2138_s16 = scalar_lea.hbm %s2759_s11, 512 }
  0x9c   : > { %p2139_p8 = scmp.ne.s32.totalorder %s2759_s11, %s2138_s16  ;;  %p2145_p9 = scmp.lt.u32.totalorder %s2138_s16, %s2759_s11 }
  0x9e   : > { %p2141_p11 = pnand %p2139_p8, %p2415_p2 }
  0xa0   : > { %p2142_p12 = pneg %p2141_p11 }
  0xa2   : > { %p2147_p10 = pnand %p2145_p9, %p2142_p12 }
  0xa4   : > { %2150 = shalt.err (!%p2147_p10)
}
  0xa5   : > { %s2151_s30 = scalar_lea.vmem %s2486_s4, 512  ;;  %p2159_p4 = scmp.lt.s32.totalorder %s2486_s4, %s2486_s4 }
  0xa6   : > { %p2152_p13 = scmp.ne.s32.totalorder %s2486_s4, %s2151_s30  ;;  %p2160_p5 = scmp.lt.s32.totalorder %s2151_s30, %s2151_s30 }
  0xa8   : > { %p2154_p1 = pnand %p2152_p13, %p2415_p2  ;;  %p2161_p6 = por %p2160_p5, %p2159_p4 }
  0xaa   : > { %p2155_p3 = pneg %p2154_p1 }
  0xac   : > { %p2162_p7 = pnand %p2161_p6, %p2155_p3 }
  0xae   : > { %2165 = shalt.err (!%p2162_p7)
}
  0xaf   : > { %1864 = dma.hbm_to_vmem [thread:$0]  (!%p2401_p0), %s2759_s11, 512, %s2486_s4, [#allocation16], %s2260_s14, %s2260_s14, %s2261_s15  }
  0xb0   : > { %s2266_s25 = smov [#allocation18]   ;;  %s2166_s29 = scalar_lea.hbm %s2760_s12, 16 }
  0xb1   : > { %s328_s1 = sshll.u32 %s2266_s25, 4  ;;  %p2167_p8 = scmp.ne.s32.totalorder %s2760_s12, %s2166_s29  ;;  %s329_s1 = int_to_ptr.vmem [resolvable:$true] %s328_s1 }
  0xb2   : > { %p2173_p9 = scmp.lt.u32.totalorder %s2166_s29, %s2760_s12 }
  0xb3   : > { %p2169_p11 = pnand %p2167_p8, %p2415_p2 }
  0xb5   : > { %p2170_p12 = pneg %p2169_p11 }
  0xb7   : > { %p2175_p10 = pnand %p2173_p9, %p2170_p12 }
  0xb9   : > { %2178 = shalt.err (!%p2175_p10)
}
  0xba   : > { %s2179_s14 = scalar_lea.vmem %s329_s1, 16  ;;  %s2186_s15 = scalar_lea.vmem %s329_s1, 32 }
  0xbb   : > { %p2180_p13 = scmp.ne.s32.totalorder %s329_s1, %s2179_s14  ;;  %p2187_p4 = scmp.lt.s32.totalorder %s329_s1, %s329_s1 }
  0xbc   : > { %p2188_p5 = scmp.lt.s32.totalorder %s2186_s15, %s2179_s14 }
  0xbd   : > { %p2182_p1 = pnand %p2180_p13, %p2415_p2 }
  0xbe   : > { %p2189_p6 = por %p2188_p5, %p2187_p4 }
  0xbf   : > { %p2183_p3 = pneg %p2182_p1 }
  0xc1   : > { %p2190_p7 = pnand %p2189_p6, %p2183_p3 }
  0xc3   : > { %2193 = shalt.err (!%p2190_p7)
}
  0xc4   : > { %1867 = dma.hbm_to_vmem [thread:$0]  (!%p2401_p0), %s2760_s12, 16, %s329_s1, [#allocation19]  }
  0xc5   : > { %p2771_p8 = scmp.ne.s32.totalorder %s2768_s20, 0 }
  0xc6   : > { %p2772_p11 = scmp.eq.s32.totalorder (!%p2771_p8), %s2384_s19, 0 }
  0xc7   : > { %341 = sbr.rel (%p2771_p8) target bundleno = 2324 (0x914), region = 52 }
  0xce   : > { %2217 = dma.done.wait (%p2772_p11), [#allocation11], 320   ;;  %p2773_p2 = pmov %p2772_p11 }
  0xd0   : > { %2219 = vsyncadd (%p2773_p2), [#allocation11], 4294966976  ;;  %p2774_p12 = pmov %p2773_p2 }
  0xd1   : > { %p2775_p9 = pmov %p2773_p2 }
  0xd2   : > { %2221 = dma.done.wait (%p2774_p12), [#allocation13], 1024  }
  0xd3   : > { %2223 = vsyncadd (%p2775_p9), [#allocation13], 4294966272  ;;  %p2776_p10 = pmov %p2773_p2 }
  0xd4   : > { %p2777_p0 = pmov %p2773_p2 }
  0xd5   : > { %2225 = dma.done.wait (%p2776_p10), [#allocation16], 528  }
  0xd6   : > { %2227 = vsyncadd (%p2777_p0), [#allocation16], 4294966768  ;;  %p2778_p13 = pmov %p2777_p0 }
  0xd7   : > { %p2779_p1 = pmov %p2777_p0 }
  0xd8   : > { %2229 = dma.done.wait (%p2778_p13), [#allocation19], 16  }
  0xd9   : > { %2231 = vsyncadd (%p2779_p1), [#allocation19], 4294967280  ;;  %p389_p3 = scmp.lt.s32.totalorder %s2384_s19, 1  ;;  %s1559_s20 = sshll.u32 %s2384_s19, 5 }
  0xda   : > { %s2574_s23 = sld [smem:[#allocation9 + %s2384_s19]]  ;;  %s394_s28 = smul.u32 40, %s2384_s19 }
  0xdb   : > { %s390_s26 = scalar_select %p389_p3, %s2384_s19, 1 }
  0xdd   : > { %s1558_s30 = sshll.u32 %s390_s26, 3 }
  0xde   : > { %s2581_s25 = scalar_lea.vmem %s2761_s13, %s1558_s30 }
  0xe0   : > { %p1560_p4 = scmp.le.s32.totalorder %s2574_s23, 0 }
  0xe1   : > { %s2584_s1 = smov (!%p1560_p4), 0  }
  0xe2   : > { %1471 = sbr.rel (%p1560_p4) target bundleno = 1555 (0x613), region = 146 }
  0xe9 LB: >> { %s402_s2 = sadd.s32 %s2238_s1, %s1559_s20  ;;  %s2238_s1 = sphi %s2584_s1, %s399_s1  }
  0xea   : >> { %s2592_s18 = sld [smem:[#allocation5 + %s402_s2]] }
  0xeb   : >> { %s2594_s29 = sld [smem:[#allocation7 + %s402_s2]] }
  0xec   : >> { %s405_s3 = sld [smem:[#allocation6 + %s402_s2]] }
  0xf1   : >> { %p1561_p5 = scmp.le.s32.totalorder %s2594_s29, 0 }
  0xf2   : >> { %v410_v0 = vld [vmem:[#allocation12] sm:$0xff] (!%p1561_p5)  ;;  %v411_v1 = vld [vmem:[#allocation12 + $0x8] sm:$0xff] (!%p1561_p5)  ;;  %v412_v2 = vld [vmem:[#allocation12 + $0x10] sm:$0xff] (!%p1561_p5)  ;;  %s2601_s16 = sadd.s32 (!%p1561_p5), %s405_s3, %s394_s28  ;;  %v2267_v3 = vmov (!%p1561_p5), 0.0|0.0   ;;  %vm2268_vm0 = vmmov (!%p1561_p5), 0   ;;  %v2269_v6 = vmov (!%p1561_p5), 0.0  }
  0xf3   : >> { %409 = sbr.rel (%p1561_p5) target bundleno = 493 (0x1ed), region = 87  ;;  %1759 = vmatprep.subr.bf16.mxu0 (!%p1561_p5), %v2267_v3  ;;  %v2604_v4 = vpack.c.bf16 (!%p1561_p5), %v411_v1, %v410_v0  ;;  %1765 = vmatprep.subr.bf16.mxu1 (!%p1561_p5), %v2267_v3  ;;  %v413_v5 = vld [vmem:[#allocation12 + $0x18] sm:$0xff] (!%p1561_p5)  ;;  %s416_s21 = sld [smem:[#allocation8 + %s2601_s16]] (!%p1561_p5)  ;;  %vm419_vm1 = vcmask (!%p1561_p5), 261120   ;;  %v414_v16 = vld [vmem:[%s2756_s8] sm:$0x1] (!%p1561_p5) }
  0xf4   : >> { %1646 = vmatprep.mubr.msk.f32.mxu0 (!%p1561_p5), %vm2268_vm0, %v2269_v6  ;;  %1657 = vmatprep.mubr.msk.f32.mxu1 (!%p1561_p5), %vm2268_vm0, %v2269_v6  ;;  %p495_p6 = scmp.gt.s32.totalorder (!%p1561_p5), %s2594_s29, 1  ;;  %s496_s24 = sadd.s32 (!%p1561_p5), 1, %s2601_s16  ;;  %v2616_v7 = vpack.c.bf16 (!%p1561_p5), %v413_v5, %v412_v2  ;;  %vm493_vm2 = vcmask (!%p1561_p5), 778240  }
  0xf5   : >> { %1761 = vmatpush3.bf16.msra.mxu0 (!%p1561_p5), %v2604_v4  ;;  %1767 = vmatpush3.bf16.msra.mxu1 (!%p1561_p5), %v2604_v4  ;;  %s497_s14 = sld [smem:[#allocation8 + %s496_s24]] (!%p1561_p5)  ;;  %s577_s15 = sadd.s32 (!%p1561_p5), 2, %s2601_s16 }
  0xf6   : >> { %1762 = vmatprep.subr.bf16.mxu0 (!%p1561_p5), %v2267_v3  ;;  %1768 = vmatprep.subr.bf16.mxu1 (!%p1561_p5), %v2267_v3  ;;  %p576_p7 = scmp.gt.s32.totalorder (!%p1561_p5), %s2594_s29, 2  ;;  %s578_s4 = sld [smem:[#allocation8 + %s577_s15]] (!%p1561_p5) }
  0xf7   : >> { %p657_p8 = scmp.gt.s32.totalorder (!%p1561_p5), %s2594_s29, 3  ;;  %s658_s0 = sadd.s32 (!%p1561_p5), 3, %s2601_s16 }
  0xf8   : >> { %s659_s26 = sld [smem:[#allocation8 + %s658_s0]] (!%p1561_p5)  ;;  %s739_s30 = sadd.s32 (!%p1561_p5), 4, %s2601_s16 }
  0xf9   : >> { %1764 = vmatpush3.bf16.msra.mxu0 (!%p1561_p5), %v2616_v7  ;;  %1770 = vmatpush3.bf16.msra.mxu1 (!%p1561_p5), %v2616_v7  ;;  %s740_s27 = sld [smem:[#allocation8 + %s739_s30]] (!%p1561_p5)  ;;  %s417_s22 = scalar_lea.vmem (!%p1561_p5), [#allocation2], %s416_s21 }
  0xfa   : >> { %1771 = vmatprep.subr.bf16.mxu0 %v2267_v3  ;;  %v418_v8 = vld [vmem:[%s417_s22] sm:$0x1]  ;;  %1777 = vmatprep.subr.bf16.mxu1 %v2267_v3  ;;  %p738_p11 = scmp.gt.s32.totalorder %s2594_s29, 4  ;;  %s820_s2 = sadd.s32 5, %s2601_s16 }
  0xfb   : >> { %s2783_s14 = smov (!%p495_p6, %s497_s14), 0  ;;  %s821_s3 = sld [smem:[#allocation8 + %s820_s2]] }
  0xfc   : >> { %1647 = vmatmul.mubr.msk.f32.vlgmr.msra.gmra.mrb[0].mxu0 %vm419_vm1, %v418_v8  ;;  %s2785_s4 = smov (!%p576_p7, %s578_s4), 0  ;;  %s499_s21 = scalar_lea.vmem [#allocation2], %s2783_s14 }
  0xfd   : >> { %1773 = vmatpush3.bf16.msra.mxu0 %v2604_v4  ;;  %1668 = vmatprep.mubr.msk.f32.mxu0 %vm2268_vm0, %v2269_v6  ;;  %v500_v9 = vld [vmem:[%s499_s21] sm:$0x1]  ;;  %p819_p2 = scmp.gt.s32.totalorder %s2594_s29, 5  ;;  %s580_s24 = scalar_lea.vmem [#allocation2], %s2785_s4 }
  0xfe   : >> { %1774 = vmatprep.subr.bf16.mxu0 %v2267_v3  ;;  %1658 = vmatmul.mubr.msk.f32.vlgmr.msra.gmra.mrb[0].mxu1 %vm419_vm1, %v500_v9  ;;  %s2787_s26 = smov (!%p657_p8, %s659_s26), 0  ;;  %v581_v10 = vld [vmem:[%s580_s24] sm:$0x1]  ;;  %s901_s14 = sadd.s32 6, %s2601_s16 }
  0xff   : >> { %1779 = vmatpush3.bf16.msra.mxu1 %v2604_v4  ;;  %1679 = vmatprep.mubr.msk.f32.mxu1 %vm2268_vm0, %v2269_v6  ;;  %s2789_s27 = smov (!%p738_p11, %s740_s27), 0  ;;  %s902_s15 = sld [smem:[#allocation8 + %s901_s14]] }
 0x100   : >> { %1780 = vmatprep.subr.bf16.mxu1 %v2267_v3  ;;  %s661_s0 = scalar_lea.vmem [#allocation2], %s2787_s26  ;;  %s982_s30 = sadd.s32 7, %s2601_s16 }
 0x101   : >> { %1776 = vmatpush3.bf16.msra.mxu0 %v2616_v7  ;;  %s2791_s3 = smov (!%p819_p2, %s821_s3), 0  ;;  %v662_v11 = vld [vmem:[%s661_s0] sm:$0x1]  ;;  %s983_s4 = sld [smem:[#allocation8 + %s982_s30]] }
 0x102   : >> { %1783 = vmatprep.subr.bf16.mxu0 %v2267_v3  ;;  %p900_p12 = scmp.gt.s32.totalorder %s2594_s29, 6  ;;  %s742_s16 = scalar_lea.vmem [#allocation2], %s2789_s27 }
 0x103   : >> { %1782 = vmatpush3.bf16.msra.mxu1 %v2616_v7  ;;  %v743_v12 = vld [vmem:[%s742_s16] sm:$0x1]  ;;  %p981_p9 = scmp.gt.s32.totalorder %s2594_s29, 7  ;;  %s823_s26 = scalar_lea.vmem [#allocation2], %s2791_s3 }
 0x104   : >> { %1669 = vmatmul.mubr.msk.f32.vlgmr.msra.gmra.mrb[2].mxu0 %vm419_vm1, %v581_v10  ;;  %1789 = vmatprep.subr.bf16.mxu1 %v2267_v3  ;;  %v824_v13 = vld [vmem:[%s823_s26] sm:$0x1] }
 0x105   : >> { %1785 = vmatpush3.bf16.msra.mxu0 %v2604_v4  ;;  %1690 = vmatprep.mubr.msk.f32.mxu0 %vm2268_vm0, %v2269_v6  ;;  %s2793_s15 = smov (!%p900_p12, %s902_s15), 0 }
 0x106   : >> { %1786 = vmatprep.subr.bf16.mxu0 %v2267_v3  ;;  %1680 = vmatmul.mubr.msk.f32.vlgmr.msra.gmra.mrb[2].mxu1 %vm419_vm1, %v662_v11  ;;  %s904_s27 = scalar_lea.vmem [#allocation2], %s2793_s15 }
 0x107   : >> { %1791 = vmatpush3.bf16.msra.mxu1 %v2604_v4  ;;  %1701 = vmatprep.mubr.msk.f32.mxu1 %vm2268_vm0, %v2269_v6  ;;  %s2795_s4 = smov (!%p981_p9, %s983_s4), 0  ;;  %v905_v14 = vld [vmem:[%s904_s27] sm:$0x1] }
 0x108   : >> { %1792 = vmatprep.subr.bf16.mxu1 %v2267_v3  ;;  %s985_s22 = scalar_lea.vmem [#allocation2], %s2795_s4 }
 0x109   : >> { %1788 = vmatpush3.bf16.msra.mxu0 %v2616_v7  ;;  %v986_v15 = vld [vmem:[%s985_s22] sm:$0x1] }
 0x10a   : >> { %1795 = vmatprep.subr.bf16.mxu0 %v2267_v3 }
 0x10b   : >> { %1794 = vmatpush3.bf16.msra.mxu1 %v2616_v7 }
 0x10c   : >> { %1691 = vmatmul.mubr.msk.f32.vlgmr.msra.gmra.mrb[4].mxu0 %vm419_vm1, %v743_v12  ;;  %1801 = vmatprep.subr.bf16.mxu1 %v2267_v3 }
 0x10d   : >> { %1797 = vmatpush3.bf16.msra.mxu0 %v2604_v4  ;;  %1712 = vmatprep.mubr.msk.f32.mxu0 %vm2268_vm0, %v2269_v6 }
 0x10e   : >> { %1798 = vmatprep.subr.bf16.mxu0 %v2267_v3  ;;  %1702 = vmatmul.mubr.msk.f32.vlgmr.msra.gmra.mrb[4].mxu1 %vm419_vm1, %v824_v13 }
 0x10f   : >> { %1803 = vmatpush3.bf16.msra.mxu1 %v2604_v4  ;;  %1723 = vmatprep.mubr.msk.f32.mxu1 %vm2268_vm0, %v2269_v6 }
 0x110   : >> { %1804 = vmatprep.subr.bf16.mxu1 %v2267_v3 }
 0x111   : >> { %1800 = vmatpush3.bf16.msra.mxu0 %v2616_v7 }
 0x113   : >> { %1806 = vmatpush3.bf16.msra.mxu1 %v2616_v7 }
 0x114   : >> { %1713 = vmatmul.mubr.msk.f32.vlgmr.msra.gmra.mrb[6].mxu0 %vm419_vm1, %v905_v14 }
 0x116   : >> { %1724 = vmatmul.mubr.msk.f32.vlgmr.msra.gmra.mrb[6].mxu1 %vm419_vm1, %v986_v15 }
 0x1cf   : >> { %v489_v17 = vpop.f32.mrb[0].mxu0 }
 0x1d0   : >> { %v490_v18 = vadd.f32 %v489_v17, %v414_v16  ;;  %v1648_v19 = vpop.f32.mrb[1].mxu0 }
 0x1d1   : >> { %v570_v20 = vpop.f32.mrb[0].mxu1 }
 0x1d2   : >> { %494 = vst.msk [vmem:[#allocation3] sm:$0x1] %vm493_vm2, %v490_v18  ;;  %v571_v21 = vadd.f32 %v570_v20, %v414_v16  ;;  %v1659_v22 = vpop.f32.mrb[1].mxu1 }
 0x1d4   : >> { %575 = vst.msk [vmem:[#allocation3 + $0x1] sm:$0x1] %vm493_vm2, %v571_v21 }
 0x1d7   : >> { %v651_v23 = vpop.f32.mrb[2].mxu0 }
 0x1d8   : >> { %v652_v24 = vadd.f32 %v651_v23, %v414_v16  ;;  %v1670_v25 = vpop.f32.mrb[3].mxu0 }
 0x1d9   : >> { %v732_v26 = vpop.f32.mrb[2].mxu1 }
 0x1da   : >> { %656 = vst.msk [vmem:[#allocation3 + $0x2] sm:$0x1] %vm493_vm2, %v652_v24  ;;  %v733_v27 = vadd.f32 %v732_v26, %v414_v16  ;;  %v1681_v28 = vpop.f32.mrb[3].mxu1 }
 0x1dc   : >> { %737 = vst.msk [vmem:[#allocation3 + $0x3] sm:$0x1] %vm493_vm2, %v733_v27 }
 0x1df   : >> { %v813_v29 = vpop.f32.mrb[4].mxu0 }
 0x1e0   : >> { %v814_v30 = vadd.f32 %v813_v29, %v414_v16  ;;  %v1692_v31 = vpop.f32.mrb[5].mxu0 }
 0x1e1   : >> { %v894_v32 = vpop.f32.mrb[4].mxu1 }
 0x1e2   : >> { %818 = vst.msk [vmem:[#allocation3 + $0x4] sm:$0x1] %vm493_vm2, %v814_v30  ;;  %v895_v33 = vadd.f32 %v894_v32, %v414_v16  ;;  %v1703_v34 = vpop.f32.mrb[5].mxu1 }
 0x1e4   : >> { %899 = vst.msk [vmem:[#allocation3 + $0x5] sm:$0x1] %vm493_vm2, %v895_v33 }
 0x1e7   : >> { %v975_v35 = vpop.f32.mrb[6].mxu0 }
 0x1e8   : >> { %v976_v36 = vadd.f32 %v975_v35, %v414_v16  ;;  %v1714_v37 = vpop.f32.mrb[7].mxu0 }
 0x1e9   : >> { %v1056_v38 = vpop.f32.mrb[6].mxu1 }
 0x1ea   : >> { %980 = vst.msk [vmem:[#allocation3 + $0x6] sm:$0x1] %vm493_vm2, %v976_v36  ;;  %v1057_v39 = vadd.f32 %v1056_v38, %v414_v16  ;;  %v1725_v40 = vpop.f32.mrb[7].mxu1 }
 0x1ec   : >> { %1061 = vst.msk [vmem:[#allocation3 + $0x7] sm:$0x1] %vm493_vm2, %v1057_v39 }
 0x1ed PF: >> { %v2697_v41 = vmov 0.0   ;;  %1464 = sbr.rel (%p1561_p5) target bundleno = 1206 (0x4b6), region = 135  ;;  %v2701_v42 = vmov (!%p1561_p5), 0.0   ;;  %s2703_s21 = smov (!%p1561_p5), 0  }
 0x1f4 LB: >>> { %v1076_v43 = vlaneseq  ;;  %v1071_v44 = vld [vmem:[#allocation14] sm:$0xff]  ;;  %v1072_v45 = vld [vmem:[#allocation14 + $0x8] sm:$0xff]  ;;  %v1073_v46 = vld [vmem:[#allocation14 + $0x10] sm:$0xff]  ;;  %v2270_v47 = vmov 0.0|0.0   ;;  %vm2271_vm3 = vmmov 0   ;;  %v2272_v51 = vmov 0.0   ;;  %s2246_s21 = sphi %s2703_s21, %s1065_s21   ;;  %v2242_v42 = vphi %v2701_v42, %v2780_v42  }
 0x1f5   : >>> { %1807 = vmatprep.subr.bf16.mxu0 %v2270_v47  ;;  %v1808_v48 = vpack.c.bf16 %v1072_v45, %v1071_v44  ;;  %v1074_v49 = vld [vmem:[#allocation14 + $0x18] sm:$0xff]  ;;  %1734 = vmatprep.mubr.msk.f32.mxu0 %vm2271_vm3, %v2272_v51  ;;  %s2273_s24 = smov 96   ;;  %v1573_v55 = vld [vmem:[#allocation15] ss:$0 sm:$0xff]  ;;  %s2274_s14 = smov 64   ;;  %vm1082_vm4 = vcmask 261120  }
 0x1f6   : >>> { %v1077_v50 = vshrl.u32 %v1076_v43, 7  ;;  %v1811_v52 = vpack.c.bf16 %v1074_v49, %v1073_v46  ;;  %v2275_v57 = vmov 1966171168   ;;  %s1069_s15 = scalar_lea.vmem [#allocation3], %s2246_s21  ;;  %s1065_s21 = sadd.s32 1, %s2246_s21  }
 0x1f7   : >>> { %1809 = vmatpush3.bf16.msra.mxu0 %v1808_v48  ;;  %v1174_v58 = vunpack.c.l.s4 %v2275_v57  ;;  %v1070_v3 = vld [vmem:[%s1069_s15] sm:$0x1]  ;;  %p1064_p10 = scmp.ge.s32.totalorder %s1065_s21, %s2594_s29 }
 0x1f8   : >>> { %v1078_v53 = vsub.s32 0, %v1077_v50  ;;  %1810 = vmatprep.subr.bf16.mxu0 %v2270_v47 }
 0x1f9   : >>> { %v1175_v59 = vunpack.c.0.s8 %v1174_v58 }
 0x1fa   : >>> { %v1079_v54 = vrot.slane %v2242_v42, %v1078_v53 }
 0x1fb   : >>> { %1812 = vmatpush3.bf16.msra.mxu0 %v1811_v52  ;;  %v1178_v61 = vsub.s32 %v1175_v59, %v1077_v50 }
 0x1fc   : >>> { %1080 = vrot.lane.b32.xlu0 %v1079_v54, %s2273_s24 }
 0x200   : >>> { %1168 = vrot.lane.b32.xlu0 %v1573_v55, %s2274_s14 }
 0x26e   : >>> { %v1081_v56 = vpop.permute.xlu0 %1080 }
 0x26f   : >>> { %1735 = vmatmul.mubr.msk.f32.vlgmr.msra.gmra.mrb[0].mxu0 %vm1082_vm4, %v1081_v56 }
 0x272   : >>> { %v1169_v60 = vpop.permute.xlu0 %1168 }
 0x342   : >>> { %v1151_v62 = vpop.f32.mrb[0].mxu0 }
 0x343   : >>> { %v1171_v63 = vadd.f32 %v1169_v60, %v1151_v62  ;;  %v1736_v0 = vpop.f32.mrb[1].mxu0  ;;  %v1155_v4 = vadd.f32 %v1151_v62, %v1070_v3 }
 0x345   : >>> { %v1179_v1 = vrot.slane %v1171_v63, %v1178_v61  ;;  %v1572_v5 = vmul.f32 -1.442695, %v1155_v4 }
 0x347   : >>> { %v1186_v2 = vrot.slane %v1179_v1, %v1178_v61  ;;  %1952 = vpow2.f32 %v1572_v5 }
 0x349   : >>> { %1187 = vrot.lane.b32.xlu1 %v1186_v2, %s2274_s14 }
 0x351   : >>> { %v1953_v6 = vpop.eup %1952 }
 0x352   : >>> { %v1159_v7 = vadd.f32 1.0, %v1953_v6 }
 0x354   : >>> { %1954 = vrcp.f32 %v1159_v7 }
 0x35e   : >>> { %v1955_v8 = vpop.eup %1954 }
 0x35f   : >>> { %v1197_v14 = vsub.f32 1.0, %v1955_v8  ;;  %v1203_v16 = vmul.f32 %v2242_v42, %v1955_v8 }
 0x3bb   : >>> { %v1188_v9 = vpop.permute.xlu1 %1187 }
 0x3bc   : >>> { %v1190_v10 = vmul.f32 %v1955_v8, %v1188_v9 }
 0x3be   : >>> { %1192 = vrot.lane.b32.xlu1 %v1190_v10, %s2274_s14 }
 0x430   : >>> { %v1193_v11 = vpop.permute.xlu1 %1192 }
 0x431   : >>> { %v1195_v12 = vadd.f32 %v1193_v11, %v1070_v3 }
 0x433   : >>> { %1956 = vtanh.f32 %v1195_v12 }
 0x43d   : >>> { %v1957_v13 = vpop.eup %1956 }
 0x43e   : >>> { %1199 = vrot.lane.b32.xlu0 %v1957_v13, %s2273_s24 }
 0x4af   : >> { %1067 = sbr.rel (!%p1064_p10) target bundleno = 500 (0x1f4), region = 141 }
 0x4b0   : >>> { %v1200_v15 = vpop.permute.xlu0 %1199 }
 0x4b1   : >>> { %v1202_v17 = vmul.f32 %v1200_v15, %v1197_v14 }
 0x4b3   : >>> { %v1204_v18 = vadd.f32 %v1203_v16, %v1202_v17  }
 0x4b5   : >>> { %v2780_v42 = vmov %v1204_v18  ;;  %v2781_v41 = vmov (%p1064_p10), %v1204_v18 }
 0x4b6 PF: >> { %v1212_v19 = vlaneseq  ;;  %v1207_v20 = vld [vmem:[%s2754_s6] sm:$0xff]  ;;  %v1208_v21 = vld [vmem:[%s2754_s6 + $0x8] sm:$0xff]  ;;  %v1209_v22 = vld [vmem:[%s2754_s6 + $0x10] sm:$0xff]  ;;  %v2276_v23 = vmov 0.0|0.0   ;;  %vm2277_vm5 = vmmov 0   ;;  %v2278_v27 = vmov 0.0   ;;  %v2250_v41 = vphi %v2697_v41, %v2781_v41  }
 0x4b7   : >> { %1813 = vmatprep.subr.bf16.mxu0 %v2276_v23  ;;  %v1814_v24 = vpack.c.bf16 %v1208_v21, %v1207_v20  ;;  %v1210_v25 = vld [vmem:[%s2754_s6 + $0x18] sm:$0xff]  ;;  %1745 = vmatprep.mubr.msk.f32.mxu0 %vm2277_vm5, %v2278_v27  ;;  %s2279_s2 = smov 96   ;;  %vm1218_vm6 = vcmask 261120   ;;  %s1205_s3 = scalar_lea.vmem [#allocation10], %s2592_s18  ;;  %vm1294_vm7 = vcmask 253952  }
 0x4b8   : >> { %v1213_v26 = vshrl.u32 %v1212_v19, 7  ;;  %v1817_v28 = vpack.c.bf16 %v1210_v25, %v1209_v22  ;;  %v1206_v32 = vld [vmem:[%s1205_s3] sm:$0x1]  ;;  %s1293_s21 = scalar_lea.vmem [#allocation2], %s2238_s1  ;;  %s399_s1 = sadd.s32 1, %s2238_s1  }
 0x4b9   : >> { %1815 = vmatpush3.bf16.msra.mxu0 %v1814_v24  ;;  %p398_p0 = scmp.ge.s32.totalorder %s399_s1, %s2574_s23 }
 0x4ba   : >> { %v1214_v29 = vsub.s32 0, %v1213_v26  ;;  %1816 = vmatprep.subr.bf16.mxu0 %v2276_v23 }
 0x4bc   : >> { %v1215_v30 = vrot.slane %v2250_v41, %v1214_v29 }
 0x4bd   : >> { %1818 = vmatpush3.bf16.msra.mxu0 %v1817_v28 }
 0x4be   : >> { %1216 = vrot.lane.b32.xlu0 %v1215_v30, %s2279_s2 }
 0x530   : >> { %v1217_v31 = vpop.permute.xlu0 %1216 }
 0x531   : >> { %1746 = vmatmul.mubr.msk.f32.vlgmr.msra.gmra.mrb[0].mxu0 %vm1218_vm6, %v1217_v31 }
 0x604   : >> { %v1287_v33 = vpop.f32.mrb[0].mxu0 }
 0x605   : >> { %v1291_v34 = vadd.f32 %v1287_v33, %v1206_v32  ;;  %v1747_v35 = vpop.f32.mrb[1].mxu0 }
 0x607   : >> { %1958 = vtanh.f32 %v1291_v34 }
 0x60c   : > { %401 = sbr.rel (!%p398_p0) target bundleno = 233 (0xe9), region = 152 }
 0x611   : >> { %v1959_v36 = vpop.eup %1958 }
 0x612   : >> { %1295 = vst.msk [vmem:[%s1293_s21] sm:$0x1] %vm1294_vm7, %v1959_v36 }
 0x613 PF: > { %v1299_v37 = vld [vmem:[#allocation17] sm:$0xff]  ;;  %v1300_v38 = vld [vmem:[#allocation17 + $0x8] sm:$0xff]  ;;  %v1301_v39 = vld [vmem:[#allocation17 + $0x10] sm:$0xff]  ;;  %v2280_v40 = vmov 0.0|0.0   ;;  %vm2281_vm8 = vmmov 0   ;;  %v2282_v43 = vmov 0.0  }
 0x614   : > { %1819 = vmatprep.subr.bf16.mxu0 %v2280_v40  ;;  %v1820_v41 = vpack.c.bf16 %v1300_v38, %v1299_v37  ;;  %v1302_v42 = vld [vmem:[#allocation17 + $0x18] sm:$0xff]  ;;  %1756 = vmatprep.mubr.msk.f32.mxu0 %vm2281_vm8, %v2282_v43  ;;  %1407 = vst [vmem:[%s2581_s25] sm:$0xff] %v2282_v43  ;;  %vm1408_vm9 = vcmask 253952   ;;  %s1580_s18 = scalar_lea.vmem [#allocation2], %s2574_s23  ;;  %vm1304_vm10 = vcmask 261120   ;;  %v1303_v46 = vld [vmem:[#allocation18] sm:$0x1] }
 0x615   : > { %v1823_v45 = vpack.c.bf16 %v1302_v42, %v1301_v39  ;;  %vm1390_vm11 = vcmask 221344   ;;  %vm1378_vm12 = vcmask 155648   ;;  %s2283_s19 = smov 108   ;;  %vm1401_vm13 = vcmask 57344  }
 0x616   : > { %1821 = vmatpush3.bf16.msra.mxu0 %v1820_v41 }
 0x617   : > { %1822 = vmatprep.subr.bf16.mxu0 %v2280_v40 }
 0x619   : > { %v1582_v44 = vld [vmem:[%s1580_s18 - $0x1] sm:$0x1] }
 0x61a   : > { %1409 = vst.msk [vmem:[%s2581_s25] sm:$0x1] %vm1408_vm9, %v1582_v44  ;;  %1824 = vmatpush3.bf16.msra.mxu0 %v1823_v45 }
 0x61d   : > { %1757 = vmatmul.mubr.msk.f32.vlgmr.msra.gmra.mrb[0].mxu0 %vm1304_vm10, %v1582_v44 }
 0x6f0   : > { %v1374_v47 = vpop.f32.mrb[0].mxu0 }
 0x6f1   : > { %v1375_v48 = vadd.f32 %v1374_v47, %v1303_v46  ;;  %v1758_v49 = vpop.f32.mrb[1].mxu0 }
 0x6f3   : > { %v1391_v50 = vsel %vm1390_vm11, %v1375_v48, -inf  ;;  %v1379_v51 = vsel %vm1378_vm12, %v1375_v48, -inf }
 0x6f4   : > { %1392 = vmax.xlane.f32.xlu0 %v1391_v50  ;;  %1380 = vmax.xlane.f32.xlu1 %v1379_v51 }
 0x781   : > { %v1393_v52 = vpop.xlane.xlu0 %1392  ;;  %v1381_v56 = vpop.xlane.xlu1 %1380 }
 0x782   : > { %v1394_v53 = vsub.f32 %v1375_v48, %v1393_v52  ;;  %v1382_v57 = vsub.f32 %v1375_v48, %v1381_v56 }
 0x784   : > { %v1395_v54 = vmul.f32 1.442695, %v1394_v53  ;;  %v1383_v58 = vmul.f32 1.442695, %v1382_v57 }
 0x786   : > { %1960 = vpow2.f32 %v1395_v54 }
 0x787   : > { %1962 = vpow2.f32 %v1383_v58 }
 0x790   : > { %v1961_v55 = vpop.eup %1960 }
 0x791   : > { %1398 = vrot.lane.b32.xlu0 %v1961_v55, %s2283_s19  ;;  %v1963_v61 = vpop.eup %1962 }
 0x792   : > { %v1385_v62 = vsel %vm1378_vm12, %v1963_v61, 0.0 }
 0x803   : > { %v1399_v59 = vpop.permute.xlu0 %1398 }
 0x804   : > { %v1402_v60 = vsel %vm1401_vm13, %v1399_v59, 0.0 }
 0x805   : > { %1403 = vadd.xlane.f32.xlu1 %v1402_v60 }
 0x809   : > { %1386 = vadd.xlane.f32.xlu1 %v1385_v62 }
 0x892   : > { %v1404_v63 = vpop.xlane.xlu1 %1403 }
 0x893   : > { %1964 = vrcp.f32 %v1404_v63 }
 0x896   : > { %v1387_v0 = vpop.xlane.xlu1 %1386 }
 0x897   : > { %1966 = vrcp.f32 %v1387_v0 }
 0x89d   : > { %v1965_v1 = vpop.eup %1964 }
 0x89e   : > { %v1406_v2 = vmul.f32 %v1965_v1, %v1961_v55 }
 0x8a0   : > { %1412 = vrot.lane.b32.xlu1 %v1406_v2, %s2283_s19 }
 0x8a1   : > { %v1967_v3 = vpop.eup %1966 }
 0x8a2   : > { %v1389_v4 = vmul.f32 %v1967_v3, %v1963_v61 }
 0x8a4   : > { %1410 = vst.msk [vmem:[%s2581_s25 + $0x1] sm:$0x1] %vm1378_vm12, %v1389_v4 }
 0x912   : > { %v1413_v5 = vpop.permute.xlu1 %1412 }
 0x913   : > { %1415 = vst.msk [vmem:[%s2581_s25 + $0x2] sm:$0x1] %vm1401_vm13, %v1413_v5 }
 0x914 PF: > { %s47_s17 = sadd.s32 1, %s2234_s17  }
 0x915   : > { %p44_p13 = scmp.ge.s32.totalorder %s47_s17, 4  }
 0x917   :  { %46 = sbr.rel (!%p44_p13) target bundleno = 57 (0x39), region = 163 }
 0x91e   :  { %1435 = vsyncpa [#allocation11], 1 }
 0x91f   :  { %1437 = vsyncpa [#allocation11 + $0x1], 1 }
 0x920   :  { %1438 = vsyncpa [#allocation13], 1 }
 0x921   :  { %1439 = vsyncpa [#allocation16], 1 }
 0x922   :  { %1440 = vsyncpa [#allocation19], 1 }

</bundles_post_ra>
